<compile_context>
chip_gen: v6e
topology: v6e:2x2x1
jax: 0.10.0
libtpu: 0.0.40
codegen_flags: <defaults>
</compile_context>

<pallas_src>
import functools

import jax
import jax.numpy as jnp
from jax.experimental import pallas as pl
from jax.experimental.pallas import tpu as pltpu

_LANE = 128


def _round_up(x, m):
    return (x + m - 1) // m * m


def _largest_divisor_leq(n, cap):
    t = max(1, min(cap, n))
    while n % t:
        t -= 1
    return t


def _conv_bn_kernel(x_ref, w_ref, shift_ref, o_ref, *, stride, dilation, KH, KW):
    # x_ref:     (1, Hp, Wp, Cin_p)        full padded image for batch element n
    # w_ref:     (KH*KW*Cin_p, Cout_p)     BN-scale-folded, flattened weights
    # shift_ref: (1, Cout_p)               folded BN shift (f32)
    # o_ref:     (1, TILE_HO, Wo, Cout_p)  output row-tile for this grid step
    _, TILE_HO, Wo, Cout_p = o_ref.shape
    Cin_p = x_ref.shape[-1]

    win_h = (TILE_HO - 1) * stride + dilation * (KH - 1) + 1
    t = pl.program_id(1)
    h_start = pl.multiple_of(t * (TILE_HO * stride), TILE_HO * stride)

    # Window of input rows needed by this output tile (dynamic offset on a major dim: cheap).
    xwin = x_ref[0, pl.ds(h_start, win_h), :, :]                   # (win_h, Wp, Cin_p)

    # im2col: the KH*KW shifted patches are concatenated along the channel axis, which is
    # lane-aligned because Cin_p % 128 == 0, so the whole conv becomes ONE fat MXU matmul
    # with contraction K = KH*KW*Cin_p (keeps the systolic array full, one push/pop).
    patches = []
    for kh in range(KH):
        for kw in range(KW):
            h0 = kh * dilation
            w0 = kw * dilation
            p = jax.lax.slice(
                xwin,
                (h0, w0, 0),
                (h0 + (TILE_HO - 1) * stride + 1,
                 w0 + (Wo - 1) * stride + 1,
                 Cin_p),
                (stride, stride, 1),
            )                                                      # (TILE_HO, Wo, Cin_p)
            patches.append(p)
    # TODO(synk): for stride>1 configs, pre-split the input into stride phases so these
    #             in-kernel reads are unit-stride instead of strided sublane access.
    lhs = jnp.concatenate(patches, axis=-1)                        # (TILE_HO, Wo, KH*KW*Cin_p)
    lhs = lhs.reshape(TILE_HO * Wo, KH * KW * Cin_p)               # layout no-op (last dim %128==0)

    acc = jnp.dot(lhs, w_ref[...], preferred_element_type=jnp.float32)   # (TILE_HO*Wo, Cout_p)
    out = acc + shift_ref[...]                   # BN shift only; scale already folded into w
    o_ref[...] = out.reshape(1, TILE_HO, Wo, Cout_p).astype(o_ref.dtype)


def basic_conv2d(x_nchw, weight_oihw, gamma, beta, running_mean, running_var,
                 *, stride=1, padding=0, dilation=1, eps=1e-5,
                 compute_dtype=jnp.float32, tile_ho_cap=8):
    """Pallas equivalent of BasicConv2d.forward: Conv2d(bias=False) -> BatchNorm2d (eval)."""
    N, Cin, H, W = x_nchw.shape
    Cout, Cin_w, KH, KW = weight_oihw.shape
    assert Cin == Cin_w

    Cin_p = _round_up(Cin, _LANE)
    Cout_p = _round_up(Cout, _LANE)

    # Glue: NCHW -> NHWC, spatial zero-pad, channel zero-pad, compute dtype.
    # TODO(synk): padding could be folded into the kernel (halo'd Element index_map) to
    #             save one extra HBM round-trip of the activation.
    x = jnp.transpose(x_nchw, (0, 2, 3, 1))                                      # (N,H,W,Cin)
    x = jnp.pad(x, ((0, 0), (padding, padding), (padding, padding), (0, Cin_p - Cin)))
    x = x.astype(compute_dtype)
    Hp, Wp = H + 2 * padding, W + 2 * padding
    Ho = (Hp - dilation * (KH - 1) - 1) // stride + 1
    Wo = (Wp - dilation * (KW - 1) - 1) // stride + 1

    # Fold BN scale into the conv weights; only the per-channel shift stays in the kernel.
    scale = gamma / jnp.sqrt(running_var + eps)                                  # (Cout,)
    shift = beta - running_mean * scale                                          # (Cout,)
    w = jnp.transpose(weight_oihw, (2, 3, 1, 0)) * scale[None, None, None, :]    # (KH,KW,Cin,Cout)
    w = jnp.pad(w, ((0, 0), (0, 0), (0, Cin_p - Cin), (0, Cout_p - Cout)))
    w = w.reshape(KH * KW * Cin_p, Cout_p).astype(compute_dtype)
    shift = jnp.pad(shift, (0, Cout_p - Cout)).reshape(1, Cout_p).astype(jnp.float32)

    TILE_HO = _largest_divisor_leq(Ho, tile_ho_cap)
    n_tiles = Ho // TILE_HO

    kernel = functools.partial(_conv_bn_kernel, stride=stride, dilation=dilation,
                               KH=KH, KW=KW)

    out_nhwc = pl.pallas_call(
        kernel,
        out_shape=jax.ShapeDtypeStruct((N, Ho, Wo, Cout_p), x_nchw.dtype),
        grid_spec=pltpu.PrefetchScalarGridSpec(
            num_scalar_prefetch=0,
            grid=(N, n_tiles),
            in_specs=[
                # Input block is the whole padded image of batch n; its block index is
                # constant across the inner (row-tile) axis so it is DMA'd once per n.
                pl.BlockSpec((1, Hp, Wp, Cin_p), lambda n, t: (n, 0, 0, 0)),
                pl.BlockSpec((KH * KW * Cin_p, Cout_p), lambda n, t: (0, 0)),
                pl.BlockSpec((1, Cout_p), lambda n, t: (0, 0)),
            ],
            out_specs=pl.BlockSpec((1, TILE_HO, Wo, Cout_p), lambda n, t: (n, t, 0, 0)),
        ),
        compiler_params=pltpu.CompilerParams(
            dimension_semantics=("parallel", "parallel"),
            vmem_limit_bytes=64 * 1024 * 1024,
        ),
    )(x, w, shift)

    # Drop channel padding, back to NCHW.
    return jnp.transpose(out_nhwc[..., :Cout], (0, 3, 1, 2))


def _reference(x_nchw, weight_oihw, gamma, beta, running_mean, running_var,
               *, stride, padding, dilation, eps=1e-5):
    y = jax.lax.conv_general_dilated(
        x_nchw, weight_oihw,
        window_strides=(stride, stride),
        padding=[(padding, padding), (padding, padding)],
        rhs_dilation=(dilation, dilation),
        dimension_numbers=("NCHW", "OIHW", "NCHW"),
    )
    s = gamma / jnp.sqrt(running_var + eps)
    b = beta - running_mean * s
    return y * s[None, :, None, None] + b[None, :, None, None]


if __name__ == "__main__":
    # BasicConv2d(in_planes=4, out_planes=8, kernel_size=3, stride=1, padding=1)
    N, Cin, H, W = 2, 4, 16, 16
    Cout, K, stride, padding, dilation = 8, 3, 1, 1, 1

    key = jax.random.PRNGKey(0)
    k_x, k_w, k_g, k_b, k_m, k_v = jax.random.split(key, 6)

    x = jax.random.normal(k_x, (N, Cin, H, W), jnp.float32)
    weight = jax.random.normal(k_w, (Cout, Cin, K, K), jnp.float32) * 0.1
    gamma = 1.0 + 0.1 * jax.random.normal(k_g, (Cout,), jnp.float32)
    beta = 0.1 * jax.random.normal(k_b, (Cout,), jnp.float32)
    running_mean = 0.1 * jax.random.normal(k_m, (Cout,), jnp.float32)
    running_var = jax.random.uniform(k_v, (Cout,), jnp.float32, 0.5, 1.5)

    ref = _reference(x, weight, gamma, beta, running_mean, running_var,
                     stride=stride, padding=padding, dilation=dilation)

    # Exact (f32 MXU inputs) path.
    out = basic_conv2d(x, weight, gamma, beta, running_mean, running_var,
                       stride=stride, padding=padding, dilation=dilation,
                       compute_dtype=jnp.float32)
    out = jax.block_until_ready(out)
    assert out.shape == (N, Cout, H, W)
    assert jnp.allclose(out, ref, atol=1e-4, rtol=1e-4)

    # bf16-input MXU path (v6e/v7x fast path), f32 accumulation -> looser tolerance.
    out_bf16 = basic_conv2d(x, weight, gamma, beta, running_mean, running_var,
                            stride=stride, padding=padding, dilation=dilation,
                            compute_dtype=jnp.bfloat16)
    out_bf16 = jax.block_until_ready(out_bf16)
    assert jnp.allclose(out_bf16, ref, atol=5e-2, rtol=5e-2)

    print("KERNEL_OK")
</pallas_src>

<mosaic_0001>
module attributes {stable_mosaic.version = 11 : i64} {
  func.func @_conv_bn_kernel(%arg0: i32, %arg1: i32, %arg2: memref<1x18x18x128xf32, #tpu.memory_space<vmem>>, %arg3: memref<1152x128xf32, #tpu.memory_space<vmem>>, %arg4: memref<1x128xf32, #tpu.memory_space<vmem>>, %arg5: memref<1x8x16x128xf32, #tpu.memory_space<vmem>>) attributes {dimension_semantics = [#tpu.dimension_semantics<parallel>, #tpu.dimension_semantics<parallel>], iteration_bounds = array<i64: 2, 2>, scalar_prefetch = 0 : i64, scratch_operands = 0 : i64, tpu.core_type = #tpu.core_type<tc>, window_params = [{transform_indices = @transform_0, window_bounds = array<i64: 1, 18, 18, 128>}, {pipeline_mode = #tpu.pipeline_mode<synchronous>, transform_indices = @transform_1, window_bounds = array<i64: 1152, 128>}, {pipeline_mode = #tpu.pipeline_mode<synchronous>, transform_indices = @transform_2, window_bounds = array<i64: 1, 128>}, {transform_indices = @transform_3, window_bounds = array<i64: 1, 8, 16, 128>}]} {
    %c8_i32 = arith.constant 8 : i32
    %0 = arith.muli %arg1, %c8_i32 : i32
    %1 = tpu.assume_multiple %0, 8 : i32
    %c0 = arith.constant 0 : index
    %2 = arith.index_cast %1 : i32 to index
    %c0_0 = arith.constant 0 : index
    %c0_1 = arith.constant 0 : index
    %3 = vector.load %arg2[%c0, %2, %c0_0, %c0_1] : memref<1x18x18x128xf32, #tpu.memory_space<vmem>>, vector<1x10x18x128xf32>
    %4 = vector.shape_cast %3 : vector<1x10x18x128xf32> to vector<10x18x128xf32>
    %5 = vector.extract_strided_slice %4 {offsets = [0, 0, 0], sizes = [8, 16, 128], strides = [1, 1, 1]} : vector<10x18x128xf32> to vector<8x16x128xf32>
    %6 = vector.extract_strided_slice %4 {offsets = [0, 1, 0], sizes = [8, 16, 128], strides = [1, 1, 1]} : vector<10x18x128xf32> to vector<8x16x128xf32>
    %7 = vector.extract_strided_slice %4 {offsets = [0, 2, 0], sizes = [8, 16, 128], strides = [1, 1, 1]} : vector<10x18x128xf32> to vector<8x16x128xf32>
    %8 = vector.extract_strided_slice %4 {offsets = [1, 0, 0], sizes = [8, 16, 128], strides = [1, 1, 1]} : vector<10x18x128xf32> to vector<8x16x128xf32>
    %9 = vector.extract_strided_slice %4 {offsets = [1, 1, 0], sizes = [8, 16, 128], strides = [1, 1, 1]} : vector<10x18x128xf32> to vector<8x16x128xf32>
    %10 = vector.extract_strided_slice %4 {offsets = [1, 2, 0], sizes = [8, 16, 128], strides = [1, 1, 1]} : vector<10x18x128xf32> to vector<8x16x128xf32>
    %11 = vector.extract_strided_slice %4 {offsets = [2, 0, 0], sizes = [8, 16, 128], strides = [1, 1, 1]} : vector<10x18x128xf32> to vector<8x16x128xf32>
    %12 = vector.extract_strided_slice %4 {offsets = [2, 1, 0], sizes = [8, 16, 128], strides = [1, 1, 1]} : vector<10x18x128xf32> to vector<8x16x128xf32>
    %13 = vector.extract_strided_slice %4 {offsets = [2, 2, 0], sizes = [8, 16, 128], strides = [1, 1, 1]} : vector<10x18x128xf32> to vector<8x16x128xf32>
    %14 = tpu.concatenate %5, %6, %7, %8, %9, %10, %11, %12, %13 in 2 : vector<8x16x128xf32>, vector<8x16x128xf32>, vector<8x16x128xf32>, vector<8x16x128xf32>, vector<8x16x128xf32>, vector<8x16x128xf32>, vector<8x16x128xf32>, vector<8x16x128xf32>, vector<8x16x128xf32> -> vector<8x16x1152xf32>
    %15 = vector.shape_cast %14 : vector<8x16x1152xf32> to vector<128x1152xf32>
    %c0_2 = arith.constant 0 : index
    %c0_3 = arith.constant 0 : index
    %16 = vector.load %arg3[%c0_2, %c0_3] : memref<1152x128xf32, #tpu.memory_space<vmem>>, vector<1152x128xf32>
    %cst = arith.constant dense<0.000000e+00> : vector<128x128xf32>
    %17 = tpu.matmul %15, %16, %cst {dimension_numbers = #tpu.dot_dimension_numbers<[1], [0], [0], [1], [0, 0, 1, 1], [], []>} : vector<128x1152xf32>, vector<1152x128xf32>, vector<128x128xf32> -> vector<128x128xf32>
    %c0_4 = arith.constant 0 : index
    %c0_5 = arith.constant 0 : index
    %18 = vector.load %arg4[%c0_4, %c0_5] : memref<1x128xf32, #tpu.memory_space<vmem>>, vector<1x128xf32>
    %19 = vector.broadcast %18 : vector<1x128xf32> to vector<128x128xf32>
    %20 = arith.addf %17, %19 : vector<128x128xf32>
    %21 = vector.shape_cast %20 : vector<128x128xf32> to vector<1x8x16x128xf32>
    %c0_6 = arith.constant 0 : index
    %c0_7 = arith.constant 0 : index
    %c0_8 = arith.constant 0 : index
    %c0_9 = arith.constant 0 : index
    %22 = vector.load %arg5[%c0_6, %c0_7, %c0_8, %c0_9] : memref<1x8x16x128xf32, #tpu.memory_space<vmem>>, vector<1x8x16x128xf32>
    tpu.vector_store %arg5[%c0_6, %c0_7, %c0_8, %c0_9], %21 {strides = array<i32>} : memref<1x8x16x128xf32, #tpu.memory_space<vmem>>, vector<1x8x16x128xf32>,
    return
  }
  func.func @transform_0(%arg0: i32, %arg1: i32) -> (i32, i32, i32, i32) {
    %c0_i32 = arith.constant 0 : i32
    %c0_i32_0 = arith.constant 0 : i32
    %c0_i32_1 = arith.constant 0 : i32
    %c0_i32_2 = arith.constant 0 : i32
    return %arg0, %c0_i32, %c0_i32_0, %c0_i32_1 : i32, i32, i32, i32
  }
  func.func @transform_1(%arg0: i32, %arg1: i32) -> (i32, i32) {
    %c0_i32 = arith.constant 0 : i32
    %c0_i32_0 = arith.constant 0 : i32
    %c0_i32_1 = arith.constant 0 : i32
    return %c0_i32, %c0_i32_0 : i32, i32
  }
  func.func @transform_2(%arg0: i32, %arg1: i32) -> (i32, i32) {
    %c0_i32 = arith.constant 0 : i32
    %c0_i32_0 = arith.constant 0 : i32
    %c0_i32_1 = arith.constant 0 : i32
    return %c0_i32, %c0_i32_0 : i32, i32
  }
  func.func @transform_3(%arg0: i32, %arg1: i32) -> (i32, i32, i32, i32) {
    %c0_i32 = arith.constant 0 : i32
    %c0_i32_0 = arith.constant 0 : i32
    %c0_i32_1 = arith.constant 0 : i32
    return %arg0, %arg1, %c0_i32, %c0_i32_0 : i32, i32, i32, i32
  }
}

</mosaic_0001>

<bundles_post_ra>
// kernel: tpu_custom_call.1
= control target key start
LH: loop header
LB: loop body
LE: loop exit
PB: predicated region body
PF: predicated region fallthrough
CT: control target
= control target key end

     0   :  { %8 = vsyncpa [#allocation3], 0  ;;  %s3151_s0 = inlined_call_operand.vmem [shape: f32[2,18,18,128], index: 0, kind: input, shape index: {}]   ;;  %s3152_s1 = inlined_call_operand.vmem [shape: f32[1152,128], index: 1, kind: input, shape index: {}]   ;;  %s3153_s2 = inlined_call_operand.vmem [shape: f32[1,128], index: 2, kind: input, shape index: {}]   ;;  %s3154_s3 = inlined_call_operand.hbm [shape: f32[2,16,16,128], index: 3, kind: output, shape index: {}]  }
   0x1   :  { %10 = vsyncpa [#allocation3 + $0x1], 0  ;;  %s2025_s12 = smov 0   ;;  %s2027_s13 = smov 0  }
   0x2   :  { %s2029_s14 = smov 0   ;;  %s2031_s15 = smov 0  }
   0x3   :  { %s2033_s16 = smov 0   ;;  %s2035_s17 = smov 0  }
   0x4   :  { %s2037_s18 = smov 0   ;;  %s2039_s19 = smov 0  }
   0x5 LB: > { %s1376_s20 = sadd.s32 4294967295, %s2000_s19   ;;  %s1377_s21 = sadd.s32 4294967294, %s2000_s19   ;;  %s2000_s19 = sphi %s2039_s19, %s16_s19   ;;  %s1996_s18 = sphi %s2037_s18, %s3199_s18   ;;  %s1992_s17 = sphi %s2035_s17, %s3198_s17   ;;  %s1988_s16 = sphi %s2033_s16, %s3197_s16   ;;  %s1984_s15 = sphi %s2031_s15, %s3196_s15   ;;  %s1980_s14 = sphi %s2029_s14, %s3195_s14   ;;  %s1976_s13 = sphi %s2027_s13, %s3194_s13   ;;  %s1972_s12 = sphi %s2025_s12, %s3193_s12  }
   0x6   : > { %s25_s22 = sadd.s32 1, %s1992_s17  ;;  %s28_s23 = sadd.s32 1, %s1996_s18 }
   0x7   : > { %p26_p0 = scmp.ge.s32.totalorder %s25_s22, 2  ;;  %p115_p1 = scmp.ne.s32.totalorder %s1980_s14, %s1976_s13 }
   0x8   : > { %p116_p2 = scmp.eq.s32.totalorder %s1376_s20, 3  ;;  %p121_p5 = scmp.ne.s32.totalorder %s1976_s13, %s1972_s12 }
   0x9   : > { %s3201_s22 = smov (%p26_p0, %s25_s22), 0  ;;  %s3203_s23 = smov (!%p26_p0, %s28_s23), %s1996_s18 }
   0xa   : > { %s101_s24 = ssub.s32 %s1992_s17, %s3201_s22  ;;  %p2076_p3 = por %p116_p2, %p115_p1 }
   0xb   : > { %p30_p4 = scmp.ge.s32.totalorder %s3203_s23, 2  ;;  %p122_p6 = scmp.eq.s32.totalorder %s1377_s21, 3 }
   0xc   : > { %p1380_p7 = scmp.ge.s32.totalorder %s2000_s19, 1  ;;  %p154_p9 = scmp.lt.s32.totalorder %s2000_s19, 5 }
   0xd   : > { %s3205_s23 = smov (%p30_p4, %s3203_s23), 0  ;;  %p2085_p8 = por %p122_p6, %p121_p5 }
   0xe   : > { %s100_s27 = ssub.s32 %s1996_s18, %s3205_s23  ;;  %s105_s28 = sadd.s32 1, %s1980_s14 }
   0xf   : > { %s102_s29 = sor.u32 %s101_s24, %s100_s27  ;;  %p155_p10 = pnand %p1380_p7, %p154_p9 }
  0x10   : > { %p103_p11 = scmp.eq.s32.totalorder %s102_s29, 0 }
  0x11   : > { %158 = sbr.rel (%p155_p10) target bundleno = 409 (0x199), region = 32 }
  0x12   : > { %s2094_s30 = scalar_select %p103_p11, %s1980_s14, %s105_s28  }
  0x16   : > { %v420_v0 = vld [vmem:[%s3152_s1 + $0xf8] sm:$0xff]  ;;  %v419_v4 = vld [vmem:[%s3152_s1 + $0xf0] sm:$0xff]  ;;  %v418_v8 = vld [vmem:[%s3152_s1 + $0xe8] sm:$0xff]  ;;  %p178_p12 = scmp.lt.s32.totalorder %s1988_s16, 1  ;;  %s1384_s9 = smul.u32 192, %s1984_s15  ;;  %vm241_vm0 = vcmask 1046528  }
  0x17   : > { %v452_v1 = vld [vmem:[%s3152_s1 + $0x1f8] sm:$0xff]  ;;  %1394 = vmatprep.subr.mxu0 %v420_v0  ;;  %v451_v5 = vld [vmem:[%s3152_s1 + $0x1f0] sm:$0xff]  ;;  %v450_v9 = vld [vmem:[%s3152_s1 + $0x1e8] sm:$0xff]  ;;  %vm298_vm1 = vcmask 1045504   ;;  %s175_s8 = sand.u32 1, %s1976_s13  }
  0x18   : > { %v404_v2 = vld [vmem:[%s3152_s1 + $0x78] sm:$0xff]  ;;  %1474 = vmatprep.subr.mxu1 %v452_v1  ;;  %v403_v6 = vld [vmem:[%s3152_s1 + $0x70] sm:$0xff]  ;;  %v402_v10 = vld [vmem:[%s3152_s1 + $0x68] sm:$0xff]  ;;  %s2166_s6 = scalar_select %p178_p12, %s1988_s16, 1 }
  0x19   : > { %v436_v3 = vld [vmem:[%s3152_s1 + $0x178] sm:$0xff]  ;;  %1395 = vmatpush3.msra.mxu0 %v404_v2  ;;  %v435_v7 = vld [vmem:[%s3152_s1 + $0x170] sm:$0xff]  ;;  %v434_v11 = vld [vmem:[%s3152_s1 + $0x168] sm:$0xff]  ;;  %s1381_s11 = sshll.u32 %s175_s8, 7  ;;  %s3100_s27 = scalar_lea.sflag [#allocation3], %s175_s8 }
  0x1a   : > { %1475 = vmatpush3.msra.mxu1 %v436_v3  ;;  %1396 = vmatprep.subr.mxu0 %v419_v4  ;;  %v417_v12 = vld [vmem:[%s3152_s1 + $0xe0] sm:$0xff]  ;;  %v416_v16 = vld [vmem:[%s3152_s1 + $0xd8] sm:$0xff]  ;;  %v415_v20 = vld [vmem:[%s3152_s1 + $0xd0] sm:$0xff]  ;;  %s1834_s10 = smul.u32 432, %s2166_s6  ;;  %s3044_s20 = scalar_lea.vmem [#allocation2], %s1381_s11 }
  0x1b   : > { %1476 = vmatprep.subr.mxu1 %v451_v5  ;;  %1397 = vmatpush3.msra.mxu0 %v403_v6  ;;  %v449_v13 = vld [vmem:[%s3152_s1 + $0x1e0] sm:$0xff]  ;;  %v448_v17 = vld [vmem:[%s3152_s1 + $0x1d8] sm:$0xff]  ;;  %v447_v21 = vld [vmem:[%s3152_s1 + $0x1d0] sm:$0xff]  ;;  %s2002_s6 = smov [#allocation2]  }
  0x1c   : > { %1477 = vmatpush3.msra.mxu1 %v435_v7  ;;  %1398 = vmatprep.subr.mxu0 %v418_v8  ;;  %v401_v14 = vld [vmem:[%s3152_s1 + $0x60] sm:$0xff]  ;;  %v400_v18 = vld [vmem:[%s3152_s1 + $0x58] sm:$0xff]  ;;  %v399_v22 = vld [vmem:[%s3152_s1 + $0x50] sm:$0xff]  ;;  %s182_s29 = scalar_lea.vmem %s3151_s0, %s1834_s10  ;;  %s1912_s5 = sshll.u32 %s2002_s6, 4  ;;  %s1913_s5 = int_to_ptr.vmem [resolvable:$false] %s1912_s5 }
  0x1d   : > { %1478 = vmatprep.subr.mxu1 %v450_v9  ;;  %v433_v15 = vld [vmem:[%s3152_s1 + $0x160] sm:$0xff]  ;;  %1399 = vmatpush3.msra.mxu0 %v402_v10  ;;  %v432_v19 = vld [vmem:[%s3152_s1 + $0x158] sm:$0xff]  ;;  %v431_v23 = vld [vmem:[%s3152_s1 + $0x150] sm:$0xff]  ;;  %s2239_s4 = scalar_lea.vmem %s182_s29, %s1384_s9  ;;  %s1393_s9 = sshll.u32 %s1984_s15, 4 }
  0x1e   : > { %1479 = vmatpush3.msra.mxu1 %v434_v11  ;;  %1400 = vmatprep.subr.mxu0 %v417_v12  ;;  %v414_v24 = vld [vmem:[%s3152_s1 + $0xc8] sm:$0xff]  ;;  %v413_v28 = vld [vmem:[%s3152_s1 + $0xc0] sm:$0xff]  ;;  %v412_v32 = vld [vmem:[%s3152_s1 + $0xb8] sm:$0xff]  ;;  %s1389_s29 = sshll.u32 %s1988_s16, 5  ;;  %s1914_s7 = scalar_lea.vmem %s1913_s5, 4096 }
  0x1f   : > { %1480 = vmatprep.subr.mxu1 %v449_v13  ;;  %1401 = vmatpush3.msra.mxu0 %v401_v14  ;;  %v446_v25 = vld [vmem:[%s3152_s1 + $0x1c8] sm:$0xff]  ;;  %v445_v29 = vld [vmem:[%s3152_s1 + $0x1c0] sm:$0xff]  ;;  %v444_v33 = vld [vmem:[%s3152_s1 + $0x1b8] sm:$0xff]  ;;  %s3070_s15 = sadd.s32 %s1393_s9, %s1389_s29 }
  0x20   : > { %1481 = vmatpush3.msra.mxu1 %v433_v15  ;;  %1402 = vmatprep.subr.mxu0 %v416_v16  ;;  %v398_v26 = vld [vmem:[%s3152_s1 + $0x48] sm:$0xff]  ;;  %v397_v30 = vld [vmem:[%s3152_s1 + $0x40] sm:$0xff]  ;;  %v396_v34 = vld [vmem:[%s3152_s1 + $0x38] sm:$0xff]  ;;  %s1390_s16 = sshll.u32 %s3070_s15, 7 }
  0x21   : > { %1482 = vmatprep.subr.mxu1 %v448_v17  ;;  %1403 = vmatpush3.msra.mxu0 %v400_v18  ;;  %v430_v27 = vld [vmem:[%s3152_s1 + $0x148] sm:$0xff]  ;;  %v429_v31 = vld [vmem:[%s3152_s1 + $0x140] sm:$0xff]  ;;  %v428_v35 = vld [vmem:[%s3152_s1 + $0x138] sm:$0xff]  ;;  %s3090_s24 = scalar_lea.hbm %s3154_s3, %s1390_s16 }
  0x22   : > { %1483 = vmatpush3.msra.mxu1 %v432_v19  ;;  %1404 = vmatprep.subr.mxu0 %v415_v20  ;;  %v411_v36 = vld [vmem:[%s3152_s1 + $0xb0] sm:$0xff]  ;;  %v410_v40 = vld [vmem:[%s3152_s1 + $0xa8] sm:$0xff]  ;;  %v409_v44 = vld [vmem:[%s3152_s1 + $0xa0] sm:$0xff] }
  0x23   : > { %1484 = vmatprep.subr.mxu1 %v447_v21  ;;  %1405 = vmatpush3.msra.mxu0 %v399_v22  ;;  %v443_v37 = vld [vmem:[%s3152_s1 + $0x1b0] sm:$0xff]  ;;  %v442_v41 = vld [vmem:[%s3152_s1 + $0x1a8] sm:$0xff]  ;;  %v441_v45 = vld [vmem:[%s3152_s1 + $0x1a0] sm:$0xff] }
  0x24   : > { %1485 = vmatpush3.msra.mxu1 %v431_v23  ;;  %1406 = vmatprep.subr.mxu0 %v414_v24  ;;  %v395_v38 = vld [vmem:[%s3152_s1 + $0x30] sm:$0xff]  ;;  %v394_v42 = vld [vmem:[%s3152_s1 + $0x28] sm:$0xff]  ;;  %v393_v46 = vld [vmem:[%s3152_s1 + $0x20] sm:$0xff] }
  0x25   : > { %1486 = vmatprep.subr.mxu1 %v446_v25  ;;  %1407 = vmatpush3.msra.mxu0 %v398_v26  ;;  %v427_v39 = vld [vmem:[%s3152_s1 + $0x130] sm:$0xff]  ;;  %v426_v43 = vld [vmem:[%s3152_s1 + $0x128] sm:$0xff]  ;;  %v425_v47 = vld [vmem:[%s3152_s1 + $0x120] sm:$0xff] }
  0x26   : > { %1487 = vmatpush3.msra.mxu1 %v430_v27  ;;  %1408 = vmatprep.subr.mxu0 %v413_v28  ;;  %v408_v48 = vld [vmem:[%s3152_s1 + $0x98] sm:$0xff]  ;;  %v187_v50 = vld [vmem:[%s2239_s4] sm:$0xff]  ;;  %v2261_v51 = vld [vmem:[%s2239_s4 + $0x8] sm:$0xff] }
  0x27   : > { %1488 = vmatprep.subr.mxu1 %v445_v29  ;;  %1409 = vmatpush3.msra.mxu0 %v397_v30  ;;  %v440_v49 = vld [vmem:[%s3152_s1 + $0x198] sm:$0xff]  ;;  %v407_v54 = vld [vmem:[%s3152_s1 + $0x90] sm:$0xff]  ;;  %v242_v58 = vrot.slane %v187_v50, 1  ;;  %v243_v59 = vrot.slane %v2261_v51, 1  ;;  %v406_v60 = vld [vmem:[%s3152_s1 + $0x88] sm:$0xff]  ;;  %v299_v0 = vrot.slane %v187_v50, 2 }
  0x28   : > { %1489 = vmatpush3.msra.mxu1 %v429_v31  ;;  %1410 = vmatprep.subr.mxu0 %v412_v32  ;;  %v392_v52 = vld [vmem:[%s3152_s1 + $0x18] sm:$0xff]  ;;  %v439_v55 = vld [vmem:[%s3152_s1 + $0x190] sm:$0xff]  ;;  %v438_v61 = vld [vmem:[%s3152_s1 + $0x188] sm:$0xff]  ;;  %v300_v1 = vrot.slane %v2261_v51, 2 }
  0x29   : > { %1490 = vmatprep.subr.mxu1 %v444_v33  ;;  %1411 = vmatpush3.msra.mxu0 %v396_v34  ;;  %v424_v53 = vld [vmem:[%s3152_s1 + $0x118] sm:$0xff]  ;;  %v391_v56 = vld [vmem:[%s3152_s1 + $0x10] sm:$0xff]  ;;  %v390_v62 = vld [vmem:[%s3152_s1 + $0x8] sm:$0xff]  ;;  %v244_v6 = vsel %vm241_vm0, %v242_v58, %v243_v59 }
  0x2a   : > { %1491 = vmatpush3.msra.mxu1 %v428_v35  ;;  %1412 = vmatprep.subr.mxu0 %v411_v36  ;;  %v423_v57 = vld [vmem:[%s3152_s1 + $0x110] sm:$0xff]  ;;  %v422_v63 = vld [vmem:[%s3152_s1 + $0x108] sm:$0xff]  ;;  %v405_v3 = vld [vmem:[%s3152_s1 + $0x80] sm:$0xff]  ;;  %v301_v10 = vsel %vm298_vm1, %v299_v0, %v300_v1 }
  0x2b   : > { %1492 = vmatprep.subr.mxu1 %v443_v37  ;;  %1413 = vmatpush3.msra.mxu0 %v395_v38  ;;  %v189_v2 = vld [vmem:[%s2239_s4 + $0x10] sm:$0x3]  ;;  %v437_v4 = vld [vmem:[%s3152_s1 + $0x180] sm:$0xff]  ;;  %v190_v8 = vld [vmem:[%s2239_s4 + $0x18] sm:$0xff] }
  0x2c   : > { %1493 = vmatpush3.msra.mxu1 %v427_v39  ;;  %1414 = vmatprep.subr.mxu0 %v410_v40  ;;  %v389_v5 = vld [vmem:[%s3152_s1] sm:$0xff]  ;;  %v245_v9 = vrot.slane %v189_v2, 1  ;;  %v302_v12 = vrot.slane %v189_v2, 2  ;;  %v484_v13 = vld [vmem:[%s3152_s1 + $0x2f8] sm:$0xff]  ;;  %v247_v18 = vrot.slane %v190_v8, 1  ;;  %v304_v21 = vrot.slane %v190_v8, 2 }
  0x2d   : > { %1494 = vmatprep.subr.mxu1 %v442_v41  ;;  %1415 = vmatpush3.msra.mxu0 %v394_v42  ;;  %v421_v7 = vld [vmem:[%s3152_s1 + $0x100] sm:$0xff]  ;;  %v516_v14 = vld [vmem:[%s3152_s1 + $0x3f8] sm:$0xff]  ;;  %v192_v23 = vld [vmem:[%s2239_s4 + $0x28] sm:$0x3] }
  0x2e   : > { %1495 = vmatpush3.msra.mxu1 %v426_v43  ;;  %1416 = vmatprep.subr.mxu0 %v409_v44  ;;  %v2312_v11 = vld [vmem:[%s2239_s4 + $0x20] sm:$0xff]  ;;  %v468_v15 = vld [vmem:[%s3152_s1 + $0x278] sm:$0xff]  ;;  %v246_v17 = vsel %vm241_vm0, %v243_v59, %v245_v9  ;;  %v303_v20 = vsel %vm298_vm1, %v300_v1, %v302_v12  ;;  %v483_v24 = vld [vmem:[%s3152_s1 + $0x2f0] sm:$0xff]  ;;  %v250_v30 = vrot.slane %v192_v23, 1  ;;  %v307_v33 = vrot.slane %v192_v23, 2 }
  0x2f   : > { %1496 = vmatprep.subr.mxu1 %v441_v45  ;;  %1417 = vmatpush3.msra.mxu0 %v393_v46  ;;  %v500_v16 = vld [vmem:[%s3152_s1 + $0x378] sm:$0xff]  ;;  %v248_v19 = vrot.slane %v2312_v11, 1  ;;  %v305_v22 = vrot.slane %v2312_v11, 2  ;;  %v515_v25 = vld [vmem:[%s3152_s1 + $0x3f0] sm:$0xff]  ;;  %v482_v34 = vld [vmem:[%s3152_s1 + $0x2e8] sm:$0xff] }
  0x30   : > { %1497 = vmatpush3.msra.mxu1 %v425_v47  ;;  %1418 = vmatprep.subr.mxu0 %v408_v48  ;;  %v467_v26 = vld [vmem:[%s3152_s1 + $0x270] sm:$0xff]  ;;  %v2355_v32 = vld [vmem:[%s2239_s4 + $0x38] sm:$0xff]  ;;  %v514_v35 = vld [vmem:[%s3152_s1 + $0x3e8] sm:$0xff] }
  0x31   : > { %1498 = vmatprep.subr.mxu1 %v440_v49  ;;  %1419 = vmatpush3.msra.mxu0 %v392_v52  ;;  %v499_v27 = vld [vmem:[%s3152_s1 + $0x370] sm:$0xff]  ;;  %v2346_v28 = vsel %vm241_vm0, %v247_v18, %v248_v19  ;;  %v2352_v31 = vsel %vm298_vm1, %v304_v21, %v305_v22  ;;  %v466_v36 = vld [vmem:[%s3152_s1 + $0x268] sm:$0xff]  ;;  %v2373_v38 = vsel %vm241_vm0, %v248_v19, %v250_v30  ;;  %v253_v40 = vrot.slane %v2355_v32, 1  ;;  %v195_v44 = vld [vmem:[%s2239_s4 + $0x40] sm:$0x3] }
  0x32   : > { %1499 = vmatpush3.msra.mxu1 %v424_v53  ;;  %1420 = vmatprep.subr.mxu0 %v407_v54  ;;  %v2349_v29 = vld [vmem:[%s2239_s4 + $0x30] sm:$0xff]  ;;  %v498_v37 = vld [vmem:[%s3152_s1 + $0x368] sm:$0xff]  ;;  %v2378_v41 = vsel %vm298_vm1, %v305_v22, %v307_v33  ;;  %v310_v43 = vrot.slane %v2355_v32, 2  ;;  %v481_v45 = vld [vmem:[%s3152_s1 + $0x2e0] sm:$0xff]  ;;  %v312_v54 = vrot.slane %v195_v44, 2 }
  0x33   : > { %1500 = vmatprep.subr.mxu1 %v439_v55  ;;  %1421 = vmatpush3.msra.mxu0 %v391_v56  ;;  %v252_v39 = vrot.slane %v2349_v29, 1  ;;  %v309_v42 = vrot.slane %v2349_v29, 2  ;;  %v513_v46 = vld [vmem:[%s3152_s1 + $0x3e0] sm:$0xff]  ;;  %v2409_v53 = vld [vmem:[%s2239_s4 + $0x50] sm:$0xff]  ;;  %v480_v55 = vld [vmem:[%s3152_s1 + $0x2d8] sm:$0xff] }
  0x34   : > { %1501 = vmatpush3.msra.mxu1 %v423_v57  ;;  %1422 = vmatprep.subr.mxu0 %v406_v60  ;;  %v465_v47 = vld [vmem:[%s3152_s1 + $0x260] sm:$0xff]  ;;  %v512_v56 = vld [vmem:[%s3152_s1 + $0x3d8] sm:$0xff]  ;;  %v2439_v2 = vld [vmem:[%s2239_s4 + $0xc8] sm:$0xff] }
  0x35   : > { %1502 = vmatprep.subr.mxu1 %v438_v61  ;;  %1423 = vmatpush3.msra.mxu0 %v390_v62  ;;  %v497_v48 = vld [vmem:[%s3152_s1 + $0x360] sm:$0xff]  ;;  %v2400_v49 = vsel %vm241_vm0, %v252_v39, %v253_v40  ;;  %v2406_v52 = vsel %vm298_vm1, %v309_v42, %v310_v43  ;;  %v464_v58 = vld [vmem:[%s3152_s1 + $0x258] sm:$0xff]  ;;  %v511_v9 = vld [vmem:[%s3152_s1 + $0x3d0] sm:$0xff] }
  0x36   : > { %1503 = vmatpush3.msra.mxu1 %v422_v63  ;;  %1424 = vmatprep.subr.mxu0 %v405_v3  ;;  %v2418_v57 = vld [vmem:[%s2239_s4 + $0xc0] sm:$0xff]  ;;  %v496_v59 = vld [vmem:[%s3152_s1 + $0x358] sm:$0xff]  ;;  %v258_v63 = vrot.slane %v2409_v53, 1  ;;  %v510_v21 = vld [vmem:[%s3152_s1 + $0x3c8] sm:$0xff] }
  0x37   : > { %1504 = vmatprep.subr.mxu1 %v437_v4  ;;  %1425 = vmatpush3.msra.mxu0 %v389_v5  ;;  %v358_v61 = vrot.slane %v2418_v57, 1  ;;  %v198_v1 = vld [vmem:[%s2239_s4 + $0x58] sm:$0x3]  ;;  %v365_v3 = vrot.slane %v2418_v57, 2  ;;  %v2443_v4 = vsel %vm298_vm1, %v310_v43, %v312_v54  ;;  %v315_v5 = vrot.slane %v2409_v53, 2  ;;  %v462_v30 = vld [vmem:[%s3152_s1 + $0x248] sm:$0xff] }
  0x38   : > { %604 = vmatprep.mubr.f32.mxu0 %v244_v6  ;;  %1505 = vmatpush3.msra.mxu1 %v421_v7  ;;  %v359_v6 = vrot.slane %v2439_v2, 1  ;;  %v366_v7 = vrot.slane %v2439_v2, 2  ;;  %v260_v12 = vrot.slane %v198_v1, 1  ;;  %v317_v18 = vrot.slane %v198_v1, 2  ;;  %v494_v33 = vld [vmem:[%s3152_s1 + $0x348] sm:$0xff] }
  0x39   : > { %749 = vmatprep.mubr.f32.mxu1 %v190_v8  ;;  %605 = vmatmul.mubr.f32.vlgmr.msra.gmra.mxu0 %v187_v50  ;;  %v2403_v50 = vld [vmem:[%s2239_s4 + $0x48] sm:$0xff] }
  0x3a   : > { %750 = vmatmul.mubr.f32.vlgmr.msra.gmra.mxu1 %v301_v10  ;;  %1554 = vmatprep.subr.mxu0 %v484_v13  ;;  %v257_v60 = vrot.slane %v2403_v50, 1  ;;  %v314_v0 = vrot.slane %v2403_v50, 2  ;;  %v463_v10 = vld [vmem:[%s3152_s1 + $0x250] sm:$0xff]  ;;  %v2463_v13 = vld [vmem:[%s2239_s4 + $0x68] sm:$0xff] }
  0x3b   : > { %1634 = vmatprep.subr.mxu1 %v516_v14  ;;  %1555 = vmatpush3.msra.mxu0 %v468_v15  ;;  %v2466_v14 = vsel %vm241_vm0, %v358_v61, %v359_v6  ;;  %v2469_v15 = vsel %vm298_vm1, %v365_v3, %v366_v7  ;;  %v263_v23 = vrot.slane %v2463_v13, 1  ;;  %v216_v43 = vld [vmem:[%s2239_s4 + $0xe8] sm:$0x3]  ;;  %v493_v61 = vld [vmem:[%s3152_s1 + $0x340] sm:$0xff]  ;;  %v2559_v3 = vld [vmem:[%s2239_s4 + $0x78] sm:$0xff] }
  0x3c   : > { %1635 = vmatpush3.msra.mxu1 %v500_v16  ;;  %609 = vmatprep.mubr.f32.mxu0 %v246_v17  ;;  %v2474_v16 = vsel %vm241_vm0, %v257_v60, %v258_v63  ;;  %v2477_v17 = vld [vmem:[%s2239_s4 + $0x60] sm:$0xff]  ;;  %v2480_v19 = vsel %vm298_vm1, %v314_v0, %v315_v5  ;;  %v385_v54 = vrot.slane %v216_v43, 2 }
  0x3d   : > { %754 = vmatprep.mubr.f32.mxu1 %v2312_v11  ;;  %610 = vmatmul.mubr.f32.gmra.mxu0 %v2261_v51  ;;  %v255_v51 = vrot.slane %v195_v44, 1  ;;  %v262_v22 = vrot.slane %v2477_v17, 1  ;;  %v461_v60 = vld [vmem:[%s3152_s1 + $0x240] sm:$0xff] }
  0x3e   : > { %755 = vmatmul.mubr.f32.gmra.mxu1 %v303_v20  ;;  %1556 = vmatprep.subr.mxu0 %v483_v24  ;;  %v478_v20 = vld [vmem:[%s3152_s1 + $0x2c8] sm:$0xff]  ;;  %v319_v24 = vrot.slane %v2477_v17, 2 }
  0x3f   : > { %1636 = vmatprep.subr.mxu1 %v515_v25  ;;  %1557 = vmatpush3.msra.mxu0 %v467_v26  ;;  %v2433_v62 = vsel %vm241_vm0, %v253_v40, %v255_v51  ;;  %v320_v25 = vrot.slane %v2463_v13, 2  ;;  %v213_v26 = vld [vmem:[%s2239_s4 + $0xd0] sm:$0x3]  ;;  %v2514_v40 = vsel %vm298_vm1, %v315_v5, %v317_v18  ;;  %v378_v51 = vrot.slane %v216_v43, 1 }
  0x40   : > { %1637 = vmatpush3.msra.mxu1 %v499_v27  ;;  %614 = vmatprep.mubr.f32.mxu0 %v2346_v28  ;;  %v2494_v27 = vld [vmem:[%s2239_s4 + $0xd8] sm:$0xff]  ;;  %v368_v39 = vrot.slane %v213_v26, 2  ;;  %v2556_v1 = vsel %vm241_vm0, %v262_v22, %v263_v23 }
  0x41   : > { %759 = vmatprep.mubr.f32.mxu1 %v2349_v29  ;;  %615 = vmatmul.mubr.f32.gmra.mxu0 %v190_v8  ;;  %v479_v8 = vld [vmem:[%s3152_s1 + $0x2d0] sm:$0xff]  ;;  %v382_v44 = vrot.slane %v2494_v27, 2 }
  0x42   : > { %760 = vmatmul.mubr.f32.gmra.mxu1 %v2352_v31  ;;  %1558 = vmatprep.subr.mxu0 %v482_v34  ;;  %v2505_v34 = vsel %vm241_vm0, %v258_v63, %v260_v12  ;;  %v492_v12 = vld [vmem:[%s3152_s1 + $0x338] sm:$0xff] }
  0x43   : > { %1638 = vmatprep.subr.mxu1 %v514_v35  ;;  %1559 = vmatpush3.msra.mxu0 %v466_v36  ;;  %v361_v35 = vrot.slane %v213_v26, 1  ;;  %v2508_v36 = vld [vmem:[%s2239_s4 + $0xe0] sm:$0xff] }
  0x44   : > { %1639 = vmatpush3.msra.mxu1 %v498_v37  ;;  %619 = vmatprep.mubr.f32.mxu0 %v2373_v38  ;;  %v375_v37 = vrot.slane %v2494_v27, 1  ;;  %v376_v42 = vrot.slane %v2508_v36, 1 }
  0x45   : > { %764 = vmatprep.mubr.f32.mxu1 %v2355_v32  ;;  %620 = vmatmul.mubr.f32.gmra.mxu0 %v2312_v11  ;;  %v495_v11 = vld [vmem:[%s3152_s1 + $0x350] sm:$0xff] }
  0x46   : > { %765 = vmatmul.mubr.f32.gmra.mxu1 %v2378_v41  ;;  %1560 = vmatprep.subr.mxu0 %v481_v45  ;;  %v383_v45 = vrot.slane %v2508_v36, 2  ;;  %v2548_v63 = vsel %vm241_vm0, %v376_v42, %v378_v51  ;;  %v506_v51 = vld [vmem:[%s3152_s1 + $0x3a8] sm:$0xff] }
  0x47   : > { %1640 = vmatprep.subr.mxu1 %v513_v46  ;;  %1561 = vmatpush3.msra.mxu0 %v465_v47  ;;  %v201_v46 = vld [vmem:[%s2239_s4 + $0x70] sm:$0x3]  ;;  %v2522_v47 = vsel %vm241_vm0, %v359_v6, %v361_v35  ;;  %v2564_v6 = vsel %vm298_vm1, %v319_v24, %v320_v25  ;;  %v324_v24 = vrot.slane %v2559_v3, 2 }
  0x48   : > { %1641 = vmatpush3.msra.mxu1 %v497_v48  ;;  %624 = vmatprep.mubr.f32.mxu0 %v2400_v49  ;;  %v2525_v48 = vsel %vm298_vm1, %v366_v7, %v368_v39  ;;  %v2551_v0 = vsel %vm298_vm1, %v383_v45, %v385_v54  ;;  %v265_v5 = vrot.slane %v201_v46, 1  ;;  %v2567_v7 = vld [vmem:[%s2239_s4 + $0x80] sm:$0xff]  ;;  %v491_v35 = vld [vmem:[%s3152_s1 + $0x330] sm:$0xff]  ;;  %v458_v54 = vld [vmem:[%s3152_s1 + $0x228] sm:$0xff] }
  0x49   : > { %769 = vmatprep.mubr.f32.mxu1 %v2403_v50  ;;  %625 = vmatmul.mubr.f32.gmra.mxu0 %v2349_v29  ;;  %v325_v26 = vrot.slane %v2567_v7, 2  ;;  %v2618_v39 = vld [vmem:[%s2239_s4 + $0x90] sm:$0xff] }
  0x4a   : > { %770 = vmatmul.mubr.f32.gmra.mxu1 %v2406_v52  ;;  %1562 = vmatprep.subr.mxu0 %v480_v55  ;;  %v477_v55 = vld [vmem:[%s3152_s1 + $0x2c0] sm:$0xff]  ;;  %v2586_v18 = vsel %vm241_vm0, %v263_v23, %v265_v5  ;;  %v475_v23 = vld [vmem:[%s3152_s1 + $0x2b0] sm:$0xff] }
  0x4b   : > { %1642 = vmatprep.subr.mxu1 %v512_v56  ;;  %1563 = vmatpush3.msra.mxu0 %v464_v58  ;;  %v509_v56 = vld [vmem:[%s3152_s1 + $0x3c0] sm:$0xff]  ;;  %v2534_v58 = vsel %vm241_vm0, %v375_v37, %v376_v42  ;;  %v2621_v43 = vsel %vm298_vm1, %v324_v24, %v325_v26 }
  0x4c   : > { %1643 = vmatpush3.msra.mxu1 %v496_v59  ;;  %629 = vmatprep.mubr.f32.mxu0 %v2433_v62  ;;  %v2537_v59 = vsel %vm298_vm1, %v382_v44, %v383_v45  ;;  %v2624_v44 = vld [vmem:[%s2239_s4 + $0x98] sm:$0xff] }
  0x4d   : > { %774 = vmatprep.mubr.f32.mxu1 %v2409_v53  ;;  %630 = vmatmul.mubr.f32.gmra.mxu0 %v2355_v32 }
  0x4e   : > { %775 = vmatmul.mubr.f32.gmra.mxu1 %v2443_v4  ;;  %1564 = vmatprep.subr.mxu0 %v479_v8  ;;  %v322_v8 = vrot.slane %v201_v46, 2  ;;  %v474_v46 = vld [vmem:[%s3152_s1 + $0x2a8] sm:$0xff] }
  0x4f   : > { %1644 = vmatprep.subr.mxu1 %v511_v9  ;;  %1565 = vmatpush3.msra.mxu0 %v463_v10  ;;  %v476_v9 = vld [vmem:[%s3152_s1 + $0x2b8] sm:$0xff] }
  0x50   : > { %1645 = vmatpush3.msra.mxu1 %v495_v11  ;;  %634 = vmatprep.mubr.f32.mxu0 %v2474_v16  ;;  %v508_v10 = vld [vmem:[%s3152_s1 + $0x3b8] sm:$0xff]  ;;  %v2593_v22 = vsel %vm298_vm1, %v320_v25, %v322_v8  ;;  %v459_v25 = vld [vmem:[%s3152_s1 + $0x230] sm:$0xff]  ;;  %v329_v8 = vrot.slane %v2618_v39, 2 }
  0x51   : > { %779 = vmatprep.mubr.f32.mxu1 %v2477_v17  ;;  %635 = vmatmul.mubr.f32.gmra.mxu0 %v2403_v50  ;;  %v460_v11 = vld [vmem:[%s3152_s1 + $0x238] sm:$0xff] }
  0x52   : > { %780 = vmatmul.mubr.f32.gmra.mxu1 %v2480_v19  ;;  %1566 = vmatprep.subr.mxu0 %v478_v20  ;;  %v267_v20 = vrot.slane %v2559_v3, 1 }
  0x53   : > { %1646 = vmatprep.subr.mxu1 %v510_v21  ;;  %1567 = vmatpush3.msra.mxu0 %v462_v30  ;;  %v268_v21 = vrot.slane %v2567_v7, 1  ;;  %v204_v30 = vld [vmem:[%s2239_s4 + $0x88] sm:$0x3] }
  0x54   : > { %1647 = vmatpush3.msra.mxu1 %v494_v33  ;;  %639 = vmatprep.mubr.f32.mxu0 %v2505_v34  ;;  %v507_v33 = vld [vmem:[%s3152_s1 + $0x3b0] sm:$0xff]  ;;  %v270_v42 = vrot.slane %v204_v30, 1  ;;  %v327_v45 = vrot.slane %v204_v30, 2 }
  0x55   : > { %784 = vmatprep.mubr.f32.mxu1 %v2463_v13  ;;  %640 = vmatmul.mubr.f32.gmra.mxu0 %v2409_v53  ;;  %v2615_v37 = vsel %vm241_vm0, %v267_v20, %v268_v21  ;;  %v457_v20 = vld [vmem:[%s3152_s1 + $0x220] sm:$0xff] }
  0x56   : > { %785 = vmatmul.mubr.f32.gmra.mxu1 %v2514_v40  ;;  %1568 = vmatprep.subr.mxu0 %v477_v55  ;;  %v490_v55 = vld [vmem:[%s3152_s1 + $0x328] sm:$0xff]  ;;  %v2648_v5 = vsel %vm298_vm1, %v325_v26, %v327_v45  ;;  %v456_v45 = vld [vmem:[%s3152_s1 + $0x218] sm:$0xff] }
  0x57   : > { %1648 = vmatprep.subr.mxu1 %v509_v56  ;;  %1569 = vmatpush3.msra.mxu0 %v461_v60  ;;  %v2643_v56 = vsel %vm241_vm0, %v268_v21, %v270_v42  ;;  %v272_v60 = vrot.slane %v2618_v39, 1  ;;  %v489_v21 = vld [vmem:[%s3152_s1 + $0x320] sm:$0xff]  ;;  %v2673_v26 = vld [vmem:[%s2239_s4 + $0xa8] sm:$0xff]  ;;  %v504_v42 = vld [vmem:[%s3152_s1 + $0x398] sm:$0xff] }
  0x58   : > { %1649 = vmatpush3.msra.mxu1 %v493_v61  ;;  %644 = vmatprep.mubr.f32.mxu0 %v2556_v1  ;;  %v273_v61 = vrot.slane %v2624_v44, 1 }
  0x59   : > { %789 = vmatprep.mubr.f32.mxu1 %v2559_v3  ;;  %645 = vmatmul.mubr.f32.gmra.mxu0 %v2477_v17 }
  0x5a   : > { %790 = vmatmul.mubr.f32.gmra.mxu1 %v2564_v6  ;;  %1570 = vmatprep.subr.mxu0 %v476_v9  ;;  %v330_v9 = vrot.slane %v2624_v44, 2  ;;  %v2670_v24 = vsel %vm241_vm0, %v272_v60, %v273_v61 }
  0x5b   : > { %1650 = vmatprep.subr.mxu1 %v508_v10  ;;  %1571 = vmatpush3.msra.mxu0 %v460_v11  ;;  %v207_v10 = vld [vmem:[%s2239_s4 + $0xa0] sm:$0x3] }
  0x5c   : > { %1651 = vmatpush3.msra.mxu1 %v492_v12  ;;  %649 = vmatprep.mubr.f32.mxu0 %v2586_v18  ;;  %v473_v11 = vld [vmem:[%s3152_s1 + $0x2a0] sm:$0xff]  ;;  %v275_v30 = vrot.slane %v207_v10, 1 }
  0x5d   : > { %794 = vmatprep.mubr.f32.mxu1 %v2567_v7  ;;  %650 = vmatmul.mubr.f32.gmra.mxu0 %v2463_v13  ;;  %v505_v12 = vld [vmem:[%s3152_s1 + $0x3a0] sm:$0xff] }
  0x5e   : > { %795 = vmatmul.mubr.f32.gmra.mxu1 %v2593_v22  ;;  %1572 = vmatprep.subr.mxu0 %v475_v23  ;;  %v2676_v23 = vsel %vm298_vm1, %v329_v8, %v330_v9  ;;  %v334_v8 = vrot.slane %v2673_v26, 2 }
  0x5f   : > { %1652 = vmatprep.subr.mxu1 %v507_v33  ;;  %1573 = vmatpush3.msra.mxu0 %v459_v25  ;;  %v2679_v33 = vld [vmem:[%s2239_s4 + $0xb0] sm:$0xff]  ;;  %v332_v25 = vrot.slane %v207_v10, 2 }
  0x60   : > { %1653 = vmatpush3.msra.mxu1 %v491_v35  ;;  %654 = vmatprep.mubr.f32.mxu0 %v2615_v37  ;;  %v472_v35 = vld [vmem:[%s3152_s1 + $0x298] sm:$0xff]  ;;  %v335_v10 = vrot.slane %v2679_v33, 2 }
  0x61   : > { %799 = vmatprep.mubr.f32.mxu1 %v2618_v39  ;;  %655 = vmatmul.mubr.f32.gmra.mxu0 %v2559_v3  ;;  %v2703_v60 = vsel %vm298_vm1, %v330_v9, %v332_v25  ;;  %v455_v9 = vld [vmem:[%s3152_s1 + $0x210] sm:$0xff] }
  0x62   : > { %800 = vmatmul.mubr.f32.gmra.mxu1 %v2621_v43  ;;  %1574 = vmatprep.subr.mxu0 %v474_v46  ;;  %v488_v46 = vld [vmem:[%s3152_s1 + $0x318] sm:$0xff]  ;;  %v2728_v25 = vsel %vm298_vm1, %v334_v8, %v335_v10 }
  0x63   : > { %1654 = vmatprep.subr.mxu1 %v506_v51  ;;  %1575 = vmatpush3.msra.mxu0 %v458_v54  ;;  %v2698_v51 = vsel %vm241_vm0, %v273_v61, %v275_v30  ;;  %v277_v54 = vrot.slane %v2673_v26, 1  ;;  %v471_v61 = vld [vmem:[%s3152_s1 + $0x290] sm:$0xff] }
  0x64   : > { %1655 = vmatpush3.msra.mxu1 %v490_v55  ;;  %659 = vmatprep.mubr.f32.mxu0 %v2643_v56  ;;  %v278_v55 = vrot.slane %v2679_v33, 1 }
  0x65   : > { %804 = vmatprep.mubr.f32.mxu1 %v2624_v44  ;;  %660 = vmatmul.mubr.f32.gmra.mxu0 %v2567_v7 }
  0x66   : > { %805 = vmatmul.mubr.f32.gmra.mxu1 %v2648_v5  ;;  %1576 = vmatprep.subr.mxu0 %v473_v11  ;;  %v210_v11 = vld [vmem:[%s2239_s4 + $0xb8] sm:$0x3]  ;;  %s1298_s4 = sshll.u32 %s3044_s20, 4  ;;  %s3092_s4 = int_to_ptr.vmem [resolvable:$true] %s1298_s4 }
  0x67   : > { %1656 = vmatprep.subr.mxu1 %v505_v12  ;;  %1577 = vmatpush3.msra.mxu0 %v457_v20  ;;  %v503_v12 = vld [vmem:[%s3152_s1 + $0x390] sm:$0xff]  ;;  %v280_v30 = vrot.slane %v210_v11, 1  ;;  %s1908_s28 = scalar_lea.vmem %s3092_s4, 2048  ;;  %p1915_p2 = scmp.lt.s32.totalorder %s3092_s4, %s1913_s5 }
  0x68   : > { %1657 = vmatpush3.msra.mxu1 %v489_v21  ;;  %664 = vmatprep.mubr.f32.mxu0 %v2670_v24  ;;  %v487_v20 = vld [vmem:[%s3152_s1 + $0x310] sm:$0xff]  ;;  %v2725_v21 = vsel %vm241_vm0, %v277_v54, %v278_v55  ;;  %v486_v54 = vld [vmem:[%s3152_s1 + $0x308] sm:$0xff]  ;;  %p1909_p13 = scmp.ne.s32.totalorder %s3092_s4, %s1908_s28  ;;  %p1916_p4 = scmp.lt.s32.totalorder %s1914_s7, %s1908_s28 }
  0x69   : > { %809 = vmatprep.mubr.f32.mxu1 %v2673_v26  ;;  %665 = vmatmul.mubr.f32.gmra.mxu0 %v2618_v39  ;;  %v2747_v8 = vsel %vm241_vm0, %v278_v55, %v280_v30  ;;  %v453_v55 = vld [vmem:[%s3152_s1 + $0x200] sm:$0xff] }
  0x6a   : > { %810 = vmatmul.mubr.f32.gmra.mxu1 %v2676_v23  ;;  %1578 = vmatprep.subr.mxu0 %v472_v35  ;;  %v337_v35 = vrot.slane %v210_v11, 2  ;;  %p1910_p0 = pnand %p1909_p13, %p2076_p3  ;;  %p1917_p5 = por %p1916_p4, %p1915_p2 }
  0x6b   : > { %1658 = vmatprep.subr.mxu1 %v504_v42  ;;  %1579 = vmatpush3.msra.mxu0 %v456_v45  ;;  %v470_v42 = vld [vmem:[%s3152_s1 + $0x288] sm:$0xff] }
  0x6c   : > { %1659 = vmatpush3.msra.mxu1 %v488_v46  ;;  %669 = vmatprep.mubr.f32.mxu0 %v2698_v51  ;;  %v502_v45 = vld [vmem:[%s3152_s1 + $0x388] sm:$0xff]  ;;  %v2750_v11 = vsel %vm298_vm1, %v335_v10, %v337_v35  ;;  %v485_v10 = vld [vmem:[%s3152_s1 + $0x300] sm:$0xff]  ;;  %p1911_p1 = pneg %p1910_p0 }
  0x6d   : > { %814 = vmatprep.mubr.f32.mxu1 %v2679_v33  ;;  %670 = vmatmul.mubr.f32.gmra.mxu0 %v2624_v44  ;;  %v454_v46 = vld [vmem:[%s3152_s1 + $0x208] sm:$0xff] }
  0x6e   : > { %815 = vmatmul.mubr.f32.gmra.mxu1 %v2703_v60  ;;  %1580 = vmatprep.subr.mxu0 %v471_v61  ;;  %v469_v61 = vld [vmem:[%s3152_s1 + $0x280] sm:$0xff]  ;;  %p1918_p6 = pnand %p1917_p5, %p1911_p1 }
  0x6f   : > { %1660 = vmatprep.subr.mxu1 %v503_v12  ;;  %1581 = vmatpush3.msra.mxu0 %v455_v9  ;;  %v501_v12 = vld [vmem:[%s3152_s1 + $0x380] sm:$0xff]  ;;  %v532_v9 = vld [vmem:[%s3152_s1 + $0x478] sm:$0xff] }
  0x70   : > { %1661 = vmatpush3.msra.mxu1 %v487_v20  ;;  %674 = vmatprep.mubr.f32.mxu0 %v2725_v21  ;;  %v531_v20 = vld [vmem:[%s3152_s1 + $0x470] sm:$0xff] }
  0x71   : > { %819 = vmatprep.mubr.f32.mxu1 %v2418_v57  ;;  %675 = vmatmul.mubr.f32.gmra.mxu0 %v2673_v26 }
  0x72   : > { %820 = vmatmul.mubr.f32.gmra.mxu1 %v2728_v25  ;;  %1582 = vmatprep.subr.mxu0 %v470_v42 }
  0x73   : > { %1662 = vmatprep.subr.mxu1 %v502_v45  ;;  %1583 = vmatpush3.msra.mxu0 %v454_v46 }
  0x74   : > { %1663 = vmatpush3.msra.mxu1 %v486_v54  ;;  %679 = vmatprep.mubr.f32.mxu0 %v2747_v8 }
  0x75   : > { %824 = vmatprep.mubr.f32.mxu1 %v2439_v2  ;;  %680 = vmatmul.mubr.f32.gmra.mxu0 %v2679_v33 }
  0x76   : > { %825 = vmatmul.mubr.f32.gmra.mxu1 %v2750_v11  ;;  %1584 = vmatprep.subr.mxu0 %v469_v61 }
  0x77   : > { %1664 = vmatprep.subr.mxu1 %v501_v12  ;;  %1585 = vmatpush3.msra.mxu0 %v453_v55 }
  0x78   : > { %1665 = vmatpush3.msra.mxu1 %v485_v10  ;;  %894 = vmatprep.mubr.f32.mxu0 %v2352_v31  ;;  %v528_v31 = vld [vmem:[%s3152_s1 + $0x458] sm:$0xff] }
  0x79   : > { %1039 = vmatprep.mubr.f32.mxu1 %v2400_v49  ;;  %895 = vmatmul.mubr.f32.vlgmr.msra.gmra.mxu0 %v2346_v28  ;;  %v530_v28 = vld [vmem:[%s3152_s1 + $0x468] sm:$0xff] }
  0x7a   : > { %1040 = vmatmul.mubr.f32.vlgmr.msra.gmra.mxu1 %v2349_v29  ;;  %1746 = vmatprep.subr.mxu0 %v532_v9  ;;  %v529_v29 = vld [vmem:[%s3152_s1 + $0x460] sm:$0xff] }
  0x7b   : > { %1802 = vmatprep.subr.mxu1 %v532_v9  ;;  %1747 = vmatpush3.msra.mxu0 %v532_v9 }
  0x7c   : > { %1818 = vmatpush3.msra.mxu1 %v532_v9  ;;  %899 = vmatprep.mubr.f32.mxu0 %v2378_v41  ;;  %v525_v41 = vld [vmem:[%s3152_s1 + $0x440] sm:$0xff] }
  0x7d   : > { %1044 = vmatprep.mubr.f32.mxu1 %v2433_v62  ;;  %900 = vmatmul.mubr.f32.gmra.mxu0 %v2373_v38  ;;  %v526_v38 = vld [vmem:[%s3152_s1 + $0x448] sm:$0xff] }
  0x7e   : > { %1045 = vmatmul.mubr.f32.gmra.mxu1 %v2355_v32  ;;  %1748 = vmatprep.subr.mxu0 %v531_v20  ;;  %v527_v32 = vld [vmem:[%s3152_s1 + $0x450] sm:$0xff] }
  0x7f   : > { %1803 = vmatprep.subr.mxu1 %v531_v20  ;;  %1749 = vmatpush3.msra.mxu0 %v531_v20 }
  0x80   : > { %1819 = vmatpush3.msra.mxu1 %v531_v20  ;;  %904 = vmatprep.mubr.f32.mxu0 %v2406_v52 }
  0x81   : > { %1049 = vmatprep.mubr.f32.mxu1 %v2474_v16  ;;  %905 = vmatmul.mubr.f32.gmra.mxu0 %v2400_v49  ;;  %v524_v49 = vld [vmem:[%s3152_s1 + $0x438] sm:$0xff] }
  0x82   : > { %1050 = vmatmul.mubr.f32.gmra.mxu1 %v2403_v50  ;;  %1750 = vmatprep.subr.mxu0 %v530_v28  ;;  %v523_v50 = vld [vmem:[%s3152_s1 + $0x430] sm:$0xff] }
  0x83   : > { %1804 = vmatprep.subr.mxu1 %v530_v28  ;;  %1751 = vmatpush3.msra.mxu0 %v530_v28 }
  0x84   : > { %1820 = vmatpush3.msra.mxu1 %v530_v28  ;;  %909 = vmatprep.mubr.f32.mxu0 %v2443_v4 }
  0x85   : > { %1054 = vmatprep.mubr.f32.mxu1 %v2505_v34  ;;  %910 = vmatmul.mubr.f32.gmra.mxu0 %v2433_v62  ;;  %v521_v62 = vld [vmem:[%s3152_s1 + $0x420] sm:$0xff] }
  0x86   : > { %1055 = vmatmul.mubr.f32.gmra.mxu1 %v2409_v53  ;;  %1752 = vmatprep.subr.mxu0 %v529_v29  ;;  %v522_v53 = vld [vmem:[%s3152_s1 + $0x428] sm:$0xff] }
  0x87   : > { %1805 = vmatprep.subr.mxu1 %v529_v29  ;;  %1753 = vmatpush3.msra.mxu0 %v529_v29 }
  0x88   : > { %1821 = vmatpush3.msra.mxu1 %v529_v29  ;;  %914 = vmatprep.mubr.f32.mxu0 %v2480_v19 }
  0x89   : > { %1059 = vmatprep.mubr.f32.mxu1 %v2556_v1  ;;  %915 = vmatmul.mubr.f32.gmra.mxu0 %v2474_v16  ;;  %v519_v16 = vld [vmem:[%s3152_s1 + $0x410] sm:$0xff] }
  0x8a   : > { %1060 = vmatmul.mubr.f32.gmra.mxu1 %v2477_v17  ;;  %1754 = vmatprep.subr.mxu0 %v528_v31 }
  0x8b   : > { %1806 = vmatprep.subr.mxu1 %v528_v31  ;;  %1755 = vmatpush3.msra.mxu0 %v528_v31 }
  0x8c   : > { %1822 = vmatpush3.msra.mxu1 %v528_v31  ;;  %919 = vmatprep.mubr.f32.mxu0 %v2514_v40 }
  0x8d   : > { %1064 = vmatprep.mubr.f32.mxu1 %v2586_v18  ;;  %920 = vmatmul.mubr.f32.gmra.mxu0 %v2505_v34 }
  0x8e   : > { %1065 = vmatmul.mubr.f32.gmra.mxu1 %v2463_v13  ;;  %1756 = vmatprep.subr.mxu0 %v527_v32  ;;  %v520_v13 = vld [vmem:[%s3152_s1 + $0x418] sm:$0xff] }
  0x8f   : > { %1807 = vmatprep.subr.mxu1 %v527_v32  ;;  %1757 = vmatpush3.msra.mxu0 %v527_v32 }
  0x90   : > { %1823 = vmatpush3.msra.mxu1 %v527_v32  ;;  %924 = vmatprep.mubr.f32.mxu0 %v2564_v6 }
  0x91   : > { %1069 = vmatprep.mubr.f32.mxu1 %v2615_v37  ;;  %925 = vmatmul.mubr.f32.gmra.mxu0 %v2556_v1 }
  0x92   : > { %1070 = vmatmul.mubr.f32.gmra.mxu1 %v2559_v3  ;;  %1758 = vmatprep.subr.mxu0 %v526_v38 }
  0x93   : > { %1808 = vmatprep.subr.mxu1 %v526_v38  ;;  %1759 = vmatpush3.msra.mxu0 %v526_v38 }
  0x94   : > { %1824 = vmatpush3.msra.mxu1 %v526_v38  ;;  %929 = vmatprep.mubr.f32.mxu0 %v2593_v22 }
  0x95   : > { %1074 = vmatprep.mubr.f32.mxu1 %v2643_v56  ;;  %930 = vmatmul.mubr.f32.gmra.mxu0 %v2586_v18 }
  0x96   : > { %1075 = vmatmul.mubr.f32.gmra.mxu1 %v2567_v7  ;;  %1760 = vmatprep.subr.mxu0 %v525_v41 }
  0x97   : > { %1809 = vmatprep.subr.mxu1 %v525_v41  ;;  %1761 = vmatpush3.msra.mxu0 %v525_v41 }
  0x98   : > { %1825 = vmatpush3.msra.mxu1 %v525_v41  ;;  %934 = vmatprep.mubr.f32.mxu0 %v2621_v43 }
  0x99   : > { %1079 = vmatprep.mubr.f32.mxu1 %v2670_v24  ;;  %935 = vmatmul.mubr.f32.gmra.mxu0 %v2615_v37 }
  0x9a   : > { %1080 = vmatmul.mubr.f32.gmra.mxu1 %v2618_v39  ;;  %1762 = vmatprep.subr.mxu0 %v524_v49 }
  0x9b   : > { %1810 = vmatprep.subr.mxu1 %v524_v49  ;;  %1763 = vmatpush3.msra.mxu0 %v524_v49 }
  0x9c   : > { %1826 = vmatpush3.msra.mxu1 %v524_v49  ;;  %939 = vmatprep.mubr.f32.mxu0 %v2648_v5 }
  0x9d   : > { %1084 = vmatprep.mubr.f32.mxu1 %v2698_v51  ;;  %940 = vmatmul.mubr.f32.gmra.mxu0 %v2643_v56 }
  0x9e   : > { %1085 = vmatmul.mubr.f32.gmra.mxu1 %v2624_v44  ;;  %1764 = vmatprep.subr.mxu0 %v523_v50 }
  0x9f   : > { %1811 = vmatprep.subr.mxu1 %v523_v50  ;;  %1765 = vmatpush3.msra.mxu0 %v523_v50 }
  0xa0   : > { %1827 = vmatpush3.msra.mxu1 %v523_v50  ;;  %944 = vmatprep.mubr.f32.mxu0 %v2676_v23 }
  0xa1   : > { %1089 = vmatprep.mubr.f32.mxu1 %v2725_v21  ;;  %945 = vmatmul.mubr.f32.gmra.mxu0 %v2670_v24 }
  0xa2   : > { %1090 = vmatmul.mubr.f32.gmra.mxu1 %v2673_v26  ;;  %1766 = vmatprep.subr.mxu0 %v522_v53 }
  0xa3   : > { %1812 = vmatprep.subr.mxu1 %v522_v53  ;;  %1767 = vmatpush3.msra.mxu0 %v522_v53 }
  0xa4   : > { %1828 = vmatpush3.msra.mxu1 %v522_v53  ;;  %949 = vmatprep.mubr.f32.mxu0 %v2703_v60 }
  0xa5   : > { %1094 = vmatprep.mubr.f32.mxu1 %v2747_v8  ;;  %950 = vmatmul.mubr.f32.gmra.mxu0 %v2698_v51 }
  0xa6   : > { %1095 = vmatmul.mubr.f32.gmra.mxu1 %v2679_v33  ;;  %1768 = vmatprep.subr.mxu0 %v521_v62 }
  0xa7   : > { %1813 = vmatprep.subr.mxu1 %v521_v62  ;;  %1769 = vmatpush3.msra.mxu0 %v521_v62 }
  0xa8   : > { %1829 = vmatpush3.msra.mxu1 %v521_v62  ;;  %954 = vmatprep.mubr.f32.mxu0 %v2728_v25 }
  0xa9   : > { %1099 = vmatprep.mubr.f32.mxu1 %v2466_v14  ;;  %955 = vmatmul.mubr.f32.gmra.mxu0 %v2725_v21 }
  0xaa   : > { %1100 = vmatmul.mubr.f32.gmra.mxu1 %v2418_v57  ;;  %1770 = vmatprep.subr.mxu0 %v520_v13  ;;  %v518_v57 = vld [vmem:[%s3152_s1 + $0x408] sm:$0xff] }
  0xab   : > { %1814 = vmatprep.subr.mxu1 %v520_v13  ;;  %1771 = vmatpush3.msra.mxu0 %v520_v13 }
  0xac   : > { %1830 = vmatpush3.msra.mxu1 %v520_v13  ;;  %959 = vmatprep.mubr.f32.mxu0 %v2750_v11 }
  0xad   : > { %1104 = vmatprep.mubr.f32.mxu1 %v2522_v47  ;;  %960 = vmatmul.mubr.f32.gmra.mxu0 %v2747_v8 }
  0xae   : > { %1105 = vmatmul.mubr.f32.gmra.mxu1 %v2439_v2  ;;  %1772 = vmatprep.subr.mxu0 %v519_v16  ;;  %v517_v2 = vld [vmem:[%s3152_s1 + $0x400] sm:$0xff] }
  0xaf   : > { %1815 = vmatprep.subr.mxu1 %v519_v16  ;;  %1773 = vmatpush3.msra.mxu0 %v519_v16 }
  0xb0   : > { %1831 = vmatpush3.msra.mxu1 %v519_v16  ;;  %964 = vmatprep.mubr.f32.mxu0 %v2469_v15 }
  0xb1   : > { %1109 = vmatprep.mubr.f32.mxu1 %v2534_v58  ;;  %965 = vmatmul.mubr.f32.gmra.mxu0 %v2466_v14  ;;  %v2899_v14 = vld [vmem:[%s3153_s2] ss:$0 sm:$0xff] }
  0xb2   : > { %1110 = vmatmul.mubr.f32.gmra.mxu1 %v2494_v27  ;;  %1774 = vmatprep.subr.mxu0 %v518_v57 }
  0xb3   : > { %1816 = vmatprep.subr.mxu1 %v518_v57  ;;  %1775 = vmatpush3.msra.mxu0 %v518_v57 }
  0xb4   : > { %1832 = vmatpush3.msra.mxu1 %v518_v57  ;;  %969 = vmatprep.mubr.f32.mxu0 %v2525_v48 }
  0xb5   : > { %1114 = vmatprep.mubr.f32.mxu1 %v2548_v63  ;;  %970 = vmatmul.mubr.f32.gmra.mxu0 %v2522_v47 }
  0xb6   : > { %1115 = vmatmul.mubr.f32.gmra.mxu1 %v2508_v36  ;;  %1776 = vmatprep.subr.mxu0 %v517_v2 }
  0xb7   : > { %1817 = vmatprep.subr.mxu1 %v517_v2  ;;  %1777 = vmatpush3.msra.mxu0 %v517_v2 }
  0xb8   : > { %1833 = vmatpush3.msra.mxu1 %v517_v2  ;;  %1778 = vmatprep.mubr.f32.mxu0 %v2406_v52 }
  0xb9   : > { %1790 = vmatprep.mubr.f32.mxu1 %v2676_v23  ;;  %1779 = vmatmul.mubr.f32.vlgmr.msra.gmra.mxu0 %v2443_v4 }
  0xba   : > { %1791 = vmatmul.mubr.f32.vlgmr.msra.gmra.mxu1 %v2703_v60  ;;  %1781 = vmatprep.mubr.f32.mxu0 %v2480_v19 }
  0xbb   : > { %1793 = vmatprep.mubr.f32.mxu1 %v2728_v25 }
  0xbd   : > { %1782 = vmatmul.mubr.f32.gmra.mxu0 %v2514_v40 }
  0xbe   : > { %1794 = vmatmul.mubr.f32.gmra.mxu1 %v2750_v11  ;;  %1784 = vmatprep.mubr.f32.mxu0 %v2564_v6 }
  0xbf   : > { %1796 = vmatprep.mubr.f32.mxu1 %v2469_v15 }
  0xc1   : > { %1785 = vmatmul.mubr.f32.gmra.mxu0 %v2593_v22 }
  0xc2   : > { %1797 = vmatmul.mubr.f32.gmra.mxu1 %v2525_v48  ;;  %1787 = vmatprep.mubr.f32.mxu0 %v2621_v43 }
  0xc3   : > { %1799 = vmatprep.mubr.f32.mxu1 %v2537_v59 }
  0xc5   : > { %1788 = vmatmul.mubr.f32.gmra.mxu0 %v2648_v5 }
  0xc6   : > { %1800 = vmatmul.mubr.f32.gmra.mxu1 %v2551_v0 }
  0xf9   : > { %v1426_v52 = vpop.f32.mrf.mxu0 }
  0xfa   : > { %v1506_v4 = vpop.f32.mrf.mxu1 }
  0xfb   : > { %v1427_v15 = vpop.f32.mrf.mxu0 }
  0xfc   : > { %v1507_v17 = vpop.f32.mrf.mxu1  ;;  %v1428_v19 = vadd.f32 %v1427_v15, %v1426_v52 }
  0xfd   : > { %v1508_v27 = vadd.f32 %v1507_v17, %v1506_v4  ;;  %v1429_v34 = vpop.f32.mrf.mxu0 }
  0xfe   : > { %v1509_v36 = vpop.f32.mrf.mxu1  ;;  %v607_v40 = vadd.f32 %v1428_v19, %v2899_v14 }
  0xff   : > { %v1430_v47 = vpop.f32.mrf.mxu0 }
 0x100   : > { %v1510_v48 = vpop.f32.mrf.mxu1  ;;  %v2902_v58 = vadd.f32 %v1508_v27, %v607_v40  ;;  %v1431_v59 = vadd.f32 %v1430_v47, %v1429_v34 }
 0x101   : > { %v1511_v63 = vadd.f32 %v1510_v48, %v1509_v36  ;;  %v1432_v0 = vpop.f32.mrf.mxu0 }
 0x102   : > { %v1512_v1 = vpop.f32.mrf.mxu1  ;;  %v612_v3 = vadd.f32 %v1431_v59, %v2899_v14 }
 0x103   : > { %v1433_v6 = vpop.f32.mrf.mxu0 }
 0x104   : > { %v1513_v7 = vpop.f32.mrf.mxu1  ;;  %v2905_v18 = vadd.f32 %v1511_v63, %v612_v3  ;;  %v1434_v22 = vadd.f32 %v1433_v6, %v1432_v0 }
 0x105   : > { %v1514_v37 = vadd.f32 %v1513_v7, %v1512_v1  ;;  %v1435_v39 = vpop.f32.mrf.mxu0 }
 0x106   : > { %v1515_v43 = vpop.f32.mrf.mxu1  ;;  %v617_v44 = vadd.f32 %v1434_v22, %v2899_v14 }
 0x107   : > { %v1436_v56 = vpop.f32.mrf.mxu0 }
 0x108   : > { %v1516_v5 = vpop.f32.mrf.mxu1  ;;  %v2908_v24 = vadd.f32 %v1514_v37, %v617_v44  ;;  %v1437_v26 = vadd.f32 %v1436_v56, %v1435_v39 }
 0x109   : > { %v1517_v23 = vadd.f32 %v1516_v5, %v1515_v43  ;;  %v1438_v33 = vpop.f32.mrf.mxu0 }
 0x10a   : > { %v1518_v51 = vpop.f32.mrf.mxu1  ;;  %v622_v60 = vadd.f32 %v1437_v26, %v2899_v14 }
 0x10b   : > { %v1439_v21 = vpop.f32.mrf.mxu0 }
 0x10c   : > { %v1519_v30 = vpop.f32.mrf.mxu1  ;;  %v2911_v25 = vadd.f32 %v1517_v23, %v622_v60  ;;  %v1440_v35 = vadd.f32 %v1439_v21, %v1438_v33 }
 0x10d   : > { %v1520_v42 = vadd.f32 %v1519_v30, %v1518_v51  ;;  %v1441_v45 = vpop.f32.mrf.mxu0 }
 0x10e   : > { %v1521_v46 = vpop.f32.mrf.mxu1  ;;  %v627_v54 = vadd.f32 %v1440_v35, %v2899_v14 }
 0x10f   : > { %v1442_v8 = vpop.f32.mrf.mxu0 }
 0x110   : > { %v1522_v11 = vpop.f32.mrf.mxu1  ;;  %v2914_v61 = vadd.f32 %v1520_v42, %v627_v54  ;;  %v1443_v12 = vadd.f32 %v1442_v8, %v1441_v45 }
 0x111   : > { %v1523_v55 = vadd.f32 %v1522_v11, %v1521_v46  ;;  %v1444_v10 = vpop.f32.mrf.mxu0 }
 0x112   : > { %v1524_v9 = vpop.f32.mrf.mxu1  ;;  %v632_v20 = vadd.f32 %v1443_v12, %v2899_v14 }
 0x113   : > { %v1445_v28 = vpop.f32.mrf.mxu0 }
 0x114   : > { %v1525_v29 = vpop.f32.mrf.mxu1  ;;  %v2917_v31 = vadd.f32 %v1523_v55, %v632_v20  ;;  %v1446_v32 = vadd.f32 %v1445_v28, %v1444_v10 }
 0x115   : > { %v1526_v38 = vadd.f32 %v1525_v29, %v1524_v9  ;;  %v1447_v41 = vpop.f32.mrf.mxu0 }
 0x116   : > { %v1527_v49 = vpop.f32.mrf.mxu1  ;;  %v637_v50 = vadd.f32 %v1446_v32, %v2899_v14 }
 0x117   : > { %v1448_v53 = vpop.f32.mrf.mxu0 }
 0x118   : > { %v1528_v62 = vpop.f32.mrf.mxu1  ;;  %v2920_v13 = vadd.f32 %v1526_v38, %v637_v50  ;;  %v1449_v16 = vadd.f32 %v1448_v53, %v1447_v41 }
 0x119   : > { %v1529_v57 = vadd.f32 %v1528_v62, %v1527_v49  ;;  %v1450_v2 = vpop.f32.mrf.mxu0 }
 0x11a   : > { %3157 = vst [vmem:[#allocation5_spill] sm:$0xff] %v2920_v13  ;;  %v1530_v52 = vpop.f32.mrf.mxu1  ;;  %v642_v4 = vadd.f32 %v1449_v16, %v2899_v14 }
 0x11b   : > { %v1451_v15 = vpop.f32.mrf.mxu0 }
 0x11c   : > { %v1531_v17 = vpop.f32.mrf.mxu1  ;;  %v2923_v19 = vadd.f32 %v1529_v57, %v642_v4  ;;  %v1452_v27 = vadd.f32 %v1451_v15, %v1450_v2 }
 0x11d   : > { %v1532_v34 = vadd.f32 %v1531_v17, %v1530_v52  ;;  %v1453_v36 = vpop.f32.mrf.mxu0 }
 0x11e   : > { %3158 = vst [vmem:[#allocation6_spill] sm:$0xff] %v2923_v19  ;;  %v1533_v40 = vpop.f32.mrf.mxu1  ;;  %v647_v47 = vadd.f32 %v1452_v27, %v2899_v14 }
 0x11f   : > { %v1454_v48 = vpop.f32.mrf.mxu0 }
 0x120   : > { %v1534_v59 = vpop.f32.mrf.mxu1  ;;  %v2926_v63 = vadd.f32 %v1532_v34, %v647_v47  ;;  %v1455_v0 = vadd.f32 %v1454_v48, %v1453_v36 }
 0x121   : > { %v1535_v1 = vadd.f32 %v1534_v59, %v1533_v40  ;;  %v1456_v3 = vpop.f32.mrf.mxu0 }
 0x122   : > { %v1536_v6 = vpop.f32.mrf.mxu1  ;;  %v652_v7 = vadd.f32 %v1455_v0, %v2899_v14 }
 0x123   : > { %v1457_v22 = vpop.f32.mrf.mxu0 }
 0x124   : > { %v1537_v37 = vpop.f32.mrf.mxu1  ;;  %v2929_v39 = vadd.f32 %v1535_v1, %v652_v7  ;;  %v1458_v43 = vadd.f32 %v1457_v22, %v1456_v3 }
 0x125   : > { %v1538_v44 = vadd.f32 %v1537_v37, %v1536_v6  ;;  %v1459_v56 = vpop.f32.mrf.mxu0 }
 0x126   : > { %v1539_v5 = vpop.f32.mrf.mxu1  ;;  %v657_v26 = vadd.f32 %v1458_v43, %v2899_v14 }
 0x127   : > { %v1460_v23 = vpop.f32.mrf.mxu0 }
 0x128   : > { %v1540_v33 = vpop.f32.mrf.mxu1  ;;  %v2932_v51 = vadd.f32 %v1538_v44, %v657_v26  ;;  %v1461_v60 = vadd.f32 %v1460_v23, %v1459_v56 }
 0x129   : > { %v1541_v21 = vadd.f32 %v1540_v33, %v1539_v5  ;;  %v1462_v30 = vpop.f32.mrf.mxu0 }
 0x12a   : > { %v1542_v35 = vpop.f32.mrf.mxu1  ;;  %v662_v42 = vadd.f32 %v1461_v60, %v2899_v14 }
 0x12b   : > { %v1463_v45 = vpop.f32.mrf.mxu0 }
 0x12c   : > { %v1543_v46 = vpop.f32.mrf.mxu1  ;;  %v2935_v54 = vadd.f32 %v1541_v21, %v662_v42  ;;  %v1464_v8 = vadd.f32 %v1463_v45, %v1462_v30 }
 0x12d   : > { %v1544_v11 = vadd.f32 %v1543_v46, %v1542_v35  ;;  %v1465_v12 = vpop.f32.mrf.mxu0 }
 0x12e   : > { %v1545_v55 = vpop.f32.mrf.mxu1  ;;  %v667_v10 = vadd.f32 %v1464_v8, %v2899_v14 }
 0x12f   : > { %v1466_v9 = vpop.f32.mrf.mxu0 }
 0x130   : > { %v1546_v20 = vpop.f32.mrf.mxu1  ;;  %v2938_v28 = vadd.f32 %v1544_v11, %v667_v10  ;;  %v1467_v29 = vadd.f32 %v1466_v9, %v1465_v12 }
 0x131   : > { %v1547_v32 = vadd.f32 %v1546_v20, %v1545_v55  ;;  %v1468_v38 = vpop.f32.mrf.mxu0 }
 0x132   : > { %3159 = vst [vmem:[#allocation7_spill] sm:$0xff] %v2938_v28  ;;  %v1548_v41 = vpop.f32.mrf.mxu1  ;;  %v672_v49 = vadd.f32 %v1467_v29, %v2899_v14 }
 0x133   : > { %v1469_v50 = vpop.f32.mrf.mxu0 }
 0x134   : > { %v1549_v53 = vpop.f32.mrf.mxu1  ;;  %v2941_v62 = vadd.f32 %v1547_v32, %v672_v49  ;;  %v1470_v16 = vadd.f32 %v1469_v50, %v1468_v38 }
 0x135   : > { %v1550_v57 = vadd.f32 %v1549_v53, %v1548_v41  ;;  %v1471_v2 = vpop.f32.mrf.mxu0 }
 0x136   : > { %3160 = vst [vmem:[#allocation8_spill] sm:$0xff] %v2941_v62  ;;  %v1551_v52 = vpop.f32.mrf.mxu1  ;;  %v677_v4 = vadd.f32 %v1470_v16, %v2899_v14 }
 0x137   : > { %v1472_v15 = vpop.f32.mrf.mxu0 }
 0x138   : > { %v1552_v17 = vpop.f32.mrf.mxu1  ;;  %v2944_v27 = vadd.f32 %v1550_v57, %v677_v4  ;;  %v1473_v34 = vadd.f32 %v1472_v15, %v1471_v2 }
 0x139   : > { %v1553_v36 = vadd.f32 %v1552_v17, %v1551_v52  ;;  %v1586_v40 = vpop.f32.mrf.mxu0 }
 0x13a   : > { %3161 = vst [vmem:[#allocation9_spill] sm:$0xff] %v2944_v27  ;;  %v2946_v47 = vpop.f32.mrf.mxu1  ;;  %v682_v48 = vadd.f32 %v1473_v34, %v2899_v14 }
 0x13b   : > { %v1587_v59 = vpop.f32.mrf.mxu0 }
 0x13c   : > { %v2949_v0 = vpop.f32.mrf.mxu1  ;;  %v2951_v1 = vadd.f32 %v1553_v36, %v682_v48 }
 0x13d   : > { %v1589_v3 = vpop.f32.mrf.mxu0 }
 0x13e   : > { %3162 = vst [vmem:[#allocation10_spill] sm:$0xff] %v2951_v1  ;;  %v2953_v6 = vpop.f32.mrf.mxu1 }
 0x13f   : > { %v1590_v7 = vpop.f32.mrf.mxu0 }
 0x140   : > { %v2955_v22 = vpop.f32.mrf.mxu1  ;;  %v1591_v19 = vadd.f32 %v1590_v7, %v1589_v3 }
 0x141   : > { %v1592_v37 = vpop.f32.mrf.mxu0 }
 0x142   : > { %v2957_v43 = vpop.f32.mrf.mxu1 }
 0x143   : > { %v1593_v44 = vpop.f32.mrf.mxu0 }
 0x144   : > { %v2959_v56 = vpop.f32.mrf.mxu1  ;;  %v1594_v28 = vadd.f32 %v1593_v44, %v1592_v37  ;;  %v1671_v44 = vadd.f32 %v2955_v22, %v2953_v6 }
 0x145   : > { %v1595_v5 = vpop.f32.mrf.mxu0 }
 0x146   : > { %v2961_v26 = vpop.f32.mrf.mxu1  ;;  %v907_v37 = vadd.f32 %v1594_v28, %v2908_v24 }
 0x147   : > { %v1596_v14 = vpop.f32.mrf.mxu0 }
 0x148   : > { %v2963_v23 = vpop.f32.mrf.mxu1 }
 0x149   : > { %v2965_v33 = vpop.f32.mrf.mxu0 }
 0x14a   : > { %v2967_v60 = vpop.f32.mrf.mxu1 }
 0x14b   : > { %3163 = vst [vmem:[#allocation11_spill] sm:$0xff] %v2967_v60  ;;  %v1599_v21 = vpop.f32.mrf.mxu0 }
 0x14c   : > { %v2969_v30 = vpop.f32.mrf.mxu1 }
 0x14d   : > { %3164 = vst [vmem:[#allocation12_spill] sm:$0xff] %v2969_v30  ;;  %v2971_v35 = vpop.f32.mrf.mxu0 }
 0x14e   : > { %v2973_v42 = vpop.f32.mrf.mxu1 }
 0x14f   : > { %3165 = vst [vmem:[#allocation13_spill] sm:$0xff] %v2973_v42  ;;  %v2975_v45 = vpop.f32.mrf.mxu0 }
 0x150   : > { %v2977_v46 = vpop.f32.mrf.mxu1 }
 0x151   : > { %3166 = vst [vmem:[#allocation14_spill] sm:$0xff] %v2977_v46  ;;  %v2979_v8 = vpop.f32.mrf.mxu0  ;;  %v1597_v46 = vadd.f32 %v1596_v14, %v1595_v5 }
 0x152   : > { %3167 = vst [vmem:[#allocation15_spill] sm:$0xff] %v2979_v8  ;;  %v2981_v11 = vpop.f32.mrf.mxu1 }
 0x153   : > { %3168 = vst [vmem:[#allocation16_spill] sm:$0xff] %v2981_v11  ;;  %v2983_v12 = vpop.f32.mrf.mxu0  ;;  %v912_v5 = vadd.f32 %v1597_v46, %v2911_v25  ;;  %v1603_v25 = vadd.f32 %v2975_v45, %v2971_v35 }
 0x154   : > { %3169 = vst [vmem:[#allocation17_spill] sm:$0xff] %v2983_v12  ;;  %v2985_v55 = vpop.f32.mrf.mxu1 }
 0x155   : > { %3170 = vst [vmem:[#allocation18_spill] sm:$0xff] %v2985_v55  ;;  %v2987_v10 = vpop.f32.mrf.mxu0 }
 0x156   : > { %v2989_v9 = vpop.f32.mrf.mxu1 }
 0x157   : > { %3171 = vst [vmem:[#allocation19_spill] sm:$0xff] %v2989_v9  ;;  %v2991_v20 = vpop.f32.mrf.mxu0  ;;  %v1588_v9 = vadd.f32 %v1587_v59, %v1586_v40  ;;  %v1668_v40 = vadd.f32 %v2949_v0, %v2946_v47  ;;  %v902_v59 = vadd.f32 %v1591_v19, %v2905_v18  ;;  %v1674_v19 = vadd.f32 %v2959_v56, %v2957_v43 }
 0x158   : > { %v2993_v29 = vpop.f32.mrf.mxu1  ;;  %v1600_v0 = vadd.f32 %v1599_v21, %v2965_v33 }
 0x159   : > { %3172 = vst [vmem:[#allocation20_spill] sm:$0xff] %v2993_v29  ;;  %v1610_v32 = vpop.f32.mrf.mxu0  ;;  %v897_v8 = vadd.f32 %v1588_v9, %v2902_v58  ;;  %v1047_v46 = vadd.f32 %v1671_v44, %v902_v59  ;;  %v1052_v21 = vadd.f32 %v1674_v19, %v907_v37  ;;  %v3181_v37 = vld [vmem:[#allocation11_spill] sm:$0xff] }
 0x15a   : > { %v1690_v38 = vpop.f32.mrf.mxu1 }
 0x15b   : > { %v1611_v41 = vpop.f32.mrf.mxu0  ;;  %v1042_v18 = vadd.f32 %v1668_v40, %v897_v8 }
 0x15c   : > { %v1691_v49 = vpop.f32.mrf.mxu1 }
 0x15d   : > { %v1613_v50 = vpop.f32.mrf.mxu0  ;;  %v1692_v43 = vadd.f32 %v1691_v49, %v1690_v38  ;;  %v1609_v38 = vadd.f32 %v2991_v20, %v2987_v10  ;;  %v3176_v10 = vld [vmem:[#allocation13_spill] sm:$0xff]  ;;  %v3177_v20 = vld [vmem:[#allocation14_spill] sm:$0xff] }
 0x15e   : > { %v1693_v53 = vpop.f32.mrf.mxu1 }
 0x15f   : > { %v1614_v16 = vpop.f32.mrf.mxu0 }
 0x160   : > { %v1694_v57 = vpop.f32.mrf.mxu1  ;;  %v1615_v12 = vadd.f32 %v1614_v16, %v1613_v50  ;;  %v3178_v16 = vld [vmem:[#allocation15_spill] sm:$0xff] }
 0x161   : > { %v1616_v2 = vpop.f32.mrf.mxu0  ;;  %v1695_v24 = vadd.f32 %v1694_v57, %v1693_v53  ;;  %v1683_v53 = vadd.f32 %v3177_v20, %v3176_v10  ;;  %v3179_v57 = vld [vmem:[#allocation17_spill] sm:$0xff] }
 0x162   : > { %v2995_v52 = vpop.f32.mrf.mxu1  ;;  %v942_v58 = vadd.f32 %v1615_v12, %v2929_v39  ;;  %v1677_v39 = vadd.f32 %v2963_v23, %v2961_v26  ;;  %v917_v23 = vadd.f32 %v1600_v0, %v2914_v61 }
 0x163   : > { %v1617_v4 = vpop.f32.mrf.mxu0 }
 0x164   : > { %v2997_v15 = vpop.f32.mrf.mxu1  ;;  %v1618_v14 = vadd.f32 %v1617_v4, %v1616_v2  ;;  %v1087_v33 = vadd.f32 %v1695_v24, %v942_v58  ;;  %v1057_v26 = vadd.f32 %v1677_v39, %v912_v5  ;;  %v1606_v2 = vadd.f32 %v3179_v57, %v3178_v16  ;;  %v3182_v58 = vld [vmem:[#allocation12_spill] sm:$0xff]  ;;  %v3183_v5 = vld [vmem:[#allocation6_spill] sm:$0xff] }
 0x165   : > { %v1619_v17 = vpop.f32.mrf.mxu0  ;;  %v1680_v44 = vadd.f32 %v3182_v58, %v3181_v37 }
 0x166   : > { %v1699_v34 = vpop.f32.mrf.mxu1 }
 0x167   : > { %v1620_v36 = vpop.f32.mrf.mxu0 }
 0x168   : > { %v1700_v48 = vpop.f32.mrf.mxu1 }
 0x169   : > { %v1622_v55 = vpop.f32.mrf.mxu0  ;;  %v1701_v8 = vadd.f32 %v1700_v48, %v1699_v34 }
 0x16a   : > { %v2999_v11 = vpop.f32.mrf.mxu1 }
 0x16b   : > { %3173 = vst [vmem:[#allocation21_spill] sm:$0xff] %v2999_v11  ;;  %v1623_v27 = vpop.f32.mrf.mxu0  ;;  %v1612_v11 = vadd.f32 %v1611_v41, %v1610_v32 }
 0x16c   : > { %v3001_v29 = vpop.f32.mrf.mxu1 }
 0x16d   : > { %3174 = vst [vmem:[#allocation22_spill] sm:$0xff] %v3001_v29  ;;  %v1625_v13 = vpop.f32.mrf.mxu0  ;;  %v1621_v29 = vadd.f32 %v1620_v36, %v1619_v17  ;;  %v937_v32 = vadd.f32 %v1612_v11, %v2926_v63  ;;  %v947_v63 = vadd.f32 %v1618_v14, %v2932_v51  ;;  %v1624_v11 = vadd.f32 %v1623_v27, %v1622_v55  ;;  %v3175_v27 = vld [vmem:[#allocation8_spill] sm:$0xff] }
 0x16e   : > { %v3003_v1 = vpop.f32.mrf.mxu1  ;;  %v932_v14 = vadd.f32 %v1609_v38, %v3183_v5 }
 0x16f   : > { %v1626_v30 = vpop.f32.mrf.mxu0  ;;  %v952_v28 = vadd.f32 %v1621_v29, %v2935_v54  ;;  %v1082_v54 = vadd.f32 %v1692_v43, %v937_v32  ;;  %v922_v29 = vadd.f32 %v1603_v25, %v2917_v31  ;;  %v3187_v25 = vld [vmem:[#allocation5_spill] sm:$0xff] }
 0x170   : > { %v3005_v60 = vpop.f32.mrf.mxu1  ;;  %v1627_v56 = vadd.f32 %v1626_v30, %v1625_v13  ;;  %v1698_v13 = vadd.f32 %v2997_v15, %v2995_v52  ;;  %v3180_v52 = vld [vmem:[#allocation7_spill] sm:$0xff] }
 0x171   : > { %v1628_v42 = vpop.f32.mrf.mxu0  ;;  %v1097_v49 = vadd.f32 %v1701_v8, %v952_v28  ;;  %v957_v4 = vadd.f32 %v1624_v11, %v3180_v52  ;;  %v1707_v36 = vadd.f32 %v3005_v60, %v3003_v1  ;;  %v1067_v24 = vadd.f32 %v1683_v53, %v922_v29  ;;  %v3186_v1 = vld [vmem:[#allocation10_spill] sm:$0xff]  ;;  %v3190_v11 = vld [vmem:[#allocation9_spill] sm:$0xff] }
 0x172   : > { %v3008_v62 = vpop.f32.mrf.mxu1  ;;  %v962_v55 = vadd.f32 %v1627_v56, %v3175_v27  ;;  %v1092_v34 = vadd.f32 %v1698_v13, %v947_v63  ;;  %v927_v28 = vadd.f32 %v1606_v2, %v3187_v25  ;;  %v1062_v63 = vadd.f32 %v1680_v44, %v917_v23 }
 0x173   : > { %v1629_v3 = vpop.f32.mrf.mxu0 }
 0x174   : > { %v3013_v7 = vpop.f32.mrf.mxu1  ;;  %v1630_v48 = vadd.f32 %v1629_v3, %v1628_v42  ;;  %v1107_v39 = vadd.f32 %v1707_v36, %v962_v55 }
 0x175   : > { %v1631_v9 = vpop.f32.mrf.mxu0  ;;  %v1710_v13 = vadd.f32 %v3013_v7, %v3008_v62 }
 0x176   : > { %v3021_v47 = vpop.f32.mrf.mxu1 }
 0x177   : > { %v1632_v6 = vpop.f32.mrf.mxu0 }
 0x178   : > { %v3034_v22 = vpop.f32.mrf.mxu1  ;;  %v1633_v50 = vadd.f32 %v1632_v6, %v1631_v9  ;;  %v3184_v9 = vld [vmem:[#allocation21_spill] sm:$0xff]  ;;  %v3188_v6 = vld [vmem:[#allocation19_spill] sm:$0xff] }
 0x179   : > { %v1780_v12 = vpop.f32.mrf.mxu0 }
 0x17a   : > { %v1792_v41 = vpop.f32.mrf.mxu1  ;;  %v1192_v35 = vadd.f32 %v1780_v12, %v1047_v46  ;;  %v972_v60 = vadd.f32 %v1633_v50, %v3186_v1  ;;  %v3189_v46 = vld [vmem:[#allocation20_spill] sm:$0xff]  ;;  %v967_v12 = vadd.f32 %v1630_v48, %v3190_v11 }
 0x17b   : > { %v1232_v45 = vadd.f32 %v1792_v41, %v1087_v33  ;;  %v1186_v30 = vpop.f32.mrf.mxu0  ;;  %v1689_v43 = vadd.f32 %v3189_v46, %v3188_v6 }
 0x17c   : > { %v1226_v51 = vpop.f32.mrf.mxu1  ;;  %1266 = vst [vmem:[%s3044_s20 + $0x8] sm:$0xff] %v1192_v35  ;;  %v1187_v61 = vadd.f32 %v1186_v30, %v1042_v18  ;;  %v3185_v18 = vld [vmem:[#allocation22_spill] sm:$0xff]  ;;  %v3191_v35 = vld [vmem:[#allocation16_spill] sm:$0xff]  ;;  %v1112_v7 = vadd.f32 %v1710_v13, %v967_v12 }
 0x17d   : > { %1274 = vst [vmem:[%s3044_s20 + $0x48] sm:$0xff] %v1232_v45  ;;  %v1227_v31 = vadd.f32 %v1226_v51, %v1082_v54  ;;  %v1783_v15 = vpop.f32.mrf.mxu0  ;;  %v1704_v19 = vadd.f32 %v3185_v18, %v3184_v9  ;;  %v3192_v45 = vld [vmem:[#allocation18_spill] sm:$0xff]  ;;  %v1077_v38 = vadd.f32 %v1689_v43, %v932_v14 }
 0x17e   : > { %v1795_v17 = vpop.f32.mrf.mxu1  ;;  %1265 = vst [vmem:[%s3044_s20] sm:$0xff] %v1187_v61  ;;  %v1202_v40 = vadd.f32 %v1783_v15, %v1057_v26  ;;  %v1686_v54 = vadd.f32 %v3192_v45, %v3191_v35 }
 0x17f   : > { %1273 = vst [vmem:[%s3044_s20 + $0x40] sm:$0xff] %v1227_v31  ;;  %v1242_v59 = vadd.f32 %v1795_v17, %v1097_v49  ;;  %v1196_v0 = vpop.f32.mrf.mxu0  ;;  %v1102_v8 = vadd.f32 %v1704_v19, %v957_v4 }
 0x180   : > { %v1236_v32 = vpop.f32.mrf.mxu1  ;;  %1268 = vst [vmem:[%s3044_s20 + $0x18] sm:$0xff] %v1202_v40  ;;  %v1197_v42 = vadd.f32 %v1196_v0, %v1052_v21  ;;  %v1713_v21 = vadd.f32 %v3034_v22, %v3021_v47  ;;  %v1072_v62 = vadd.f32 %v1686_v54, %v927_v28 }
 0x181   : > { %1276 = vst [vmem:[%s3044_s20 + $0x58] sm:$0xff] %v1242_v59  ;;  %v1237_v3 = vadd.f32 %v1236_v32, %v1092_v34  ;;  %v1786_v56 = vpop.f32.mrf.mxu0 }
 0x182   : > { %v1798_v33 = vpop.f32.mrf.mxu1  ;;  %1267 = vst [vmem:[%s3044_s20 + $0x10] sm:$0xff] %v1197_v42  ;;  %v1212_v41 = vadd.f32 %v1786_v56, %v1067_v24  ;;  %v1117_v22 = vadd.f32 %v1713_v21, %v972_v60 }
 0x183   : > { %1275 = vst [vmem:[%s3044_s20 + $0x50] sm:$0xff] %v1237_v3  ;;  %v1252_v26 = vadd.f32 %v1798_v33, %v1107_v39  ;;  %v1206_v23 = vpop.f32.mrf.mxu0 }
 0x184   : > { %v1246_v29 = vpop.f32.mrf.mxu1  ;;  %1270 = vst [vmem:[%s3044_s20 + $0x28] sm:$0xff] %v1212_v41  ;;  %v1207_v30 = vadd.f32 %v1206_v23, %v1062_v63 }
 0x185   : > { %1278 = vst [vmem:[%s3044_s20 + $0x68] sm:$0xff] %v1252_v26  ;;  %v1247_v47 = vadd.f32 %v1246_v29, %v1102_v8  ;;  %v1789_v51 = vpop.f32.mrf.mxu0 }
 0x186   : > { %v1801_v49 = vpop.f32.mrf.mxu1  ;;  %1269 = vst [vmem:[%s3044_s20 + $0x20] sm:$0xff] %v1207_v30  ;;  %v1222_v27 = vadd.f32 %v1789_v51, %v1077_v38 }
 0x187   : > { %1277 = vst [vmem:[%s3044_s20 + $0x60] sm:$0xff] %v1247_v47  ;;  %v1262_v55 = vadd.f32 %v1801_v49, %v1117_v22  ;;  %v1216_v50 = vpop.f32.mrf.mxu0 }
 0x188   : > { %v1256_v61 = vpop.f32.mrf.mxu1  ;;  %1272 = vst [vmem:[%s3044_s20 + $0x38] sm:$0xff] %v1222_v27  ;;  %v1217_v31 = vadd.f32 %v1216_v50, %v1072_v62 }
 0x189   : > { %1280 = vst [vmem:[%s3044_s20 + $0x78] sm:$0xff] %v1262_v55  ;;  %v1257_v10 = vadd.f32 %v1256_v61, %v1112_v7 }
 0x18a   : > { %1271 = vst [vmem:[%s3044_s20 + $0x30] sm:$0xff] %v1217_v31 }
 0x18b   : > { %1279 = vst [vmem:[%s3044_s20 + $0x70] sm:$0xff] %v1257_v10 }
 0x18c   : > { %1921 = shalt.err (!%p1918_p6)
}
 0x18d   : > { %s1922_s8 = scalar_lea.hbm %s3090_s24, 2048  ;;  %s1926_s9 = scalar_lea.hbm %s3154_s3, 8192 }
 0x18e   : > { %p1923_p7 = scmp.ne.s32.totalorder %s3090_s24, %s1922_s8  ;;  %p1927_p11 = scmp.lt.s32.totalorder %s3090_s24, %s3154_s3 }
 0x18f   : > { %p1928_p12 = scmp.lt.s32.totalorder %s1926_s9, %s1922_s8 }
 0x190   : > { %p1924_p9 = pnand %p1923_p7, %p2076_p3 }
 0x191   : > { %p1929_p13 = por %p1928_p12, %p1927_p11 }
 0x192   : > { %p1925_p10 = pneg %p1924_p9 }
 0x194   : > { %p1930_p0 = pnand %p1929_p13, %p1925_p10 }
 0x196   : > { %1933 = shalt.err (!%p1930_p0)
}
 0x197   : > { %s2003_s16 = smov 128   ;;  %s2004_s21 = smov 8  }
 0x198   : > { %1835 = dma.vmem_to_hbm [thread:$0]  (%p2076_p3), %s3092_s4, 2048, %s3090_s24, %s3100_s27, %s2003_s16, %s2003_s16, %s2004_s21  }
 0x199 PF: > { %p1841_p1 = scmp.ge.s32.totalorder %s2000_s19, 2  ;;  %s1313_s10 = sand.u32 1, %s1972_s12  }
 0x19a   : > { %s1314_s28 = scalar_lea.sflag [#allocation3], %s1313_s10 }
 0x19b   : > { %p1838_p2 = pnand %p1841_p1, %p2085_p8 }
 0x19d   : > { %p1839_p4 = pneg %p1838_p2 }
 0x19f   : > { %1967 = dma.done.wait (%p1839_p4), %s1314_s28, 2048  }
 0x1a0   : > { %1969 = vsyncadd (%p1839_p4), %s1314_s28, 4294965248  ;;  %s16_s19 = sadd.s32 1, %s2000_s19   ;;  %s3193_s12 = smov %s1976_s13 }
 0x1a1   : > { %p13_p5 = scmp.ge.s32.totalorder %s16_s19, 6   ;;  %s3194_s13 = smov %s1980_s14 }
 0x1a2   : > { %s3195_s14 = smov %s2094_s30  ;;  %s3196_s15 = smov %s1992_s17 }
 0x1a3   : > { %s3197_s16 = smov %s1996_s18  ;;  %s3198_s17 = smov %s3201_s22 }
 0x1a4   : > { %s3199_s18 = smov %s3205_s23  ;;  %15 = sbr.rel (!%p13_p5) target bundleno = 5 (0x5), region = 68 }
 0x1a9   :  { %1319 = vsyncpa [#allocation3], 1 }
 0x1aa   :  { %1321 = vsyncpa [#allocation3 + $0x1], 1 }

</bundles_post_ra>
